<compile_context>
chip_gen: v7x
topology: tpu7x:2x2x1
jax: 0.10.0
libtpu: 0.0.40
codegen_flags: <defaults>
</compile_context>

<pallas_src>
import numpy as np
import jax
import jax.numpy as jnp
from jax.experimental import pallas as pl
from jax.experimental.pallas import tpu as pltpu

HIGHEST = jax.lax.Precision.HIGHEST


def _round_up(x, m):
    return (x + m - 1) // m * m


# --------------------------- fused QKV projection ----------------------------

def _qkv_kernel(x_ref, wq_ref, wk_ref, wv_ref, bq_ref, bk_ref, bv_ref,
                q_ref, k_ref, v_ref):
    x = x_ref[...]
    q = jnp.dot(x, wq_ref[...], preferred_element_type=jnp.float32,
                precision=HIGHEST) + bq_ref[...]
    k = jnp.dot(x, wk_ref[...], preferred_element_type=jnp.float32,
                precision=HIGHEST) + bk_ref[...]
    v = jnp.dot(x, wv_ref[...], preferred_element_type=jnp.float32,
                precision=HIGHEST) + bv_ref[...]
    q_ref[...] = jnp.maximum(q, 0.0)   # relu fused (reference relu's q and k)
    k_ref[...] = jnp.maximum(k, 0.0)
    v_ref[...] = v


def qkv_linear_pallas(x, wq, wk, wv, bq, bk, bv, *, tm=128):
    n, cin = x.shape
    cout = wq.shape[1]
    tm = min(tm, n)
    n_pad = _round_up(n, tm)
    if n_pad != n:
        x = jnp.pad(x, ((0, n_pad - n), (0, 0)))
    row_spec = pl.BlockSpec((tm, cin), lambda i: (i, 0))
    w_spec = pl.BlockSpec((cin, cout), lambda i: (0, 0))
    b_spec = pl.BlockSpec((1, cout), lambda i: (0, 0))
    out_spec = pl.BlockSpec((tm, cout), lambda i: (i, 0))
    q, k, v = pl.pallas_call(
        _qkv_kernel,
        out_shape=(jax.ShapeDtypeStruct((n_pad, cout), jnp.float32),) * 3,
        grid=(n_pad // tm,),
        in_specs=[row_spec, w_spec, w_spec, w_spec, b_spec, b_spec, b_spec],
        out_specs=(out_spec, out_spec, out_spec),
        compiler_params=pltpu.CompilerParams(dimension_semantics=("parallel",)),
    )(x, wq, wk, wv, bq, bk, bv)
    return q[:n], k[:n], v[:n]


# --------------------------- plain tiled linear -------------------------------

def _linear_kernel(x_ref, w_ref, b_ref, o_ref):
    o_ref[...] = (
        jnp.dot(x_ref[...], w_ref[...], preferred_element_type=jnp.float32,
                precision=HIGHEST) + b_ref[...])


def linear_pallas(x, w, b, *, tm=128):
    n, cin = x.shape
    cout = w.shape[1]
    tm = min(tm, n)
    n_pad = _round_up(n, tm)
    if n_pad != n:
        x = jnp.pad(x, ((0, n_pad - n), (0, 0)))
    out = pl.pallas_call(
        _linear_kernel,
        out_shape=jax.ShapeDtypeStruct((n_pad, cout), jnp.float32),
        grid=(n_pad // tm,),
        in_specs=[pl.BlockSpec((tm, cin), lambda i: (i, 0)),
                  pl.BlockSpec((cin, cout), lambda i: (0, 0)),
                  pl.BlockSpec((1, cout), lambda i: (0, 0))],
        out_specs=pl.BlockSpec((tm, cout), lambda i: (i, 0)),
        compiler_params=pltpu.CompilerParams(dimension_semantics=("parallel",)),
    )(x, w, b)
    return out[:n]


# --------------------------- scatter_matmul_kv + scatter_add ------------------

def _scatter_kv_kernel(k_ref, v_ref, kv_ref, s_ref):
    # per-window block, head-major: k/v are (h, bmax, d), zero rows for padding
    k = k_ref[0]
    v = v_ref[0]
    # kv[h] = relu(k)[:, h, :]^T @ v[:, h, :]  -- one head-batched MXU matmul
    kv_ref[0] = jnp.einsum('hnd,hne->hde', k, v,
                           preferred_element_type=jnp.float32,
                           precision=HIGHEST)
    # s[h] = sum_tokens relu(k)  (scatter_add over the window)
    s_ref[0] = jnp.sum(k, axis=1)


def scatter_kv_pallas(k_pad, v_pad):
    m, h, bmax, d = k_pad.shape
    blk = pl.BlockSpec((1, h, bmax, d), lambda w: (w, 0, 0, 0))
    return pl.pallas_call(
        _scatter_kv_kernel,
        out_shape=(jax.ShapeDtypeStruct((m, h, d, d), jnp.float32),
                   jax.ShapeDtypeStruct((m, h, d), jnp.float32)),
        grid=(m,),
        in_specs=[blk, blk],
        out_specs=(pl.BlockSpec((1, h, d, d), lambda w: (w, 0, 0, 0)),
                   pl.BlockSpec((1, h, d), lambda w: (w, 0, 0))),
        compiler_params=pltpu.CompilerParams(dimension_semantics=("parallel",)),
    )(k_pad, v_pad)


# --------------------------- 3x3 sum pool (SparseSumPool2d) -------------------

def _pool3x3_kernel(kv_ref, s_ref, kvo_ref, so_ref):
    def pool(xp):
        hb = xp.shape[1] - 2
        wb = xp.shape[2] - 2
        # separable 3x3 sum: vertical taps then horizontal taps (4 adds, not 8)
        rows = xp[:, 0:hb] + xp[:, 1:hb + 1] + xp[:, 2:hb + 2]
        return rows[:, :, 0:wb] + rows[:, :, 1:wb + 1] + rows[:, :, 2:wb + 2]

    kvo_ref[...] = pool(kv_ref[...])
    so_ref[...] = pool(s_ref[...])


def pool3x3_pallas(dense_kv, dense_s):
    b, hp, wp, f_kv = dense_kv.shape
    f_s = dense_s.shape[3]
    hb, wb = hp - 2, wp - 2
    return pl.pallas_call(
        _pool3x3_kernel,
        out_shape=(jax.ShapeDtypeStruct((b, hb, wb, f_kv), jnp.float32),
                   jax.ShapeDtypeStruct((b, hb, wb, f_s), jnp.float32)),
        grid=(b,),
        in_specs=[pl.BlockSpec((1, hp, wp, f_kv), lambda i: (i, 0, 0, 0)),
                  pl.BlockSpec((1, hp, wp, f_s), lambda i: (i, 0, 0, 0))],
        out_specs=(pl.BlockSpec((1, hb, wb, f_kv), lambda i: (i, 0, 0, 0)),
                   pl.BlockSpec((1, hb, wb, f_s), lambda i: (i, 0, 0, 0))),
        compiler_params=pltpu.CompilerParams(dimension_semantics=("parallel",)),
    )(dense_kv, dense_s)


# --------------------------- scatter_matmul_qc + normalize --------------------

def _make_scatter_qc_kernel(d):
    def kernel(q_ref, c_ref, o_ref):
        q = q_ref[0]                  # (h, bmax, d): relu(q), zero rows = padding
        caug = c_ref[0]               # (h, d, d+1): [..., :d]=pooled kv, [..., d]=pooled s
        # one head-batched matmul produces both y (first d columns) and
        # z = <relu(q), s_pooled> (last column).
        ya = jnp.einsum('hnd,hde->hne', q, caug,
                        preferred_element_type=jnp.float32, precision=HIGHEST)
        y = ya[:, :, :d]
        z = ya[:, :, d:]
        o_ref[0] = y / (z + 1e-6)
    return kernel


def scatter_qc_pallas(q_pad, c_aug):
    m, h, bmax, d = q_pad.shape
    return pl.pallas_call(
        _make_scatter_qc_kernel(d),
        out_shape=jax.ShapeDtypeStruct((m, h, bmax, d), jnp.float32),
        grid=(m,),
        in_specs=[pl.BlockSpec((1, h, bmax, d), lambda w: (w, 0, 0, 0)),
                  pl.BlockSpec((1, h, d, d + 1), lambda w: (w, 0, 0, 0))],
        out_specs=pl.BlockSpec((1, h, bmax, d), lambda w: (w, 0, 0, 0)),
        compiler_params=pltpu.CompilerParams(dimension_semantics=("parallel",)),
    )(q_pad, c_aug)


# --------------------------- Module wrapper ----------------------------------

class ScatterAttentionPallas:
    def __init__(self, dim, num_heads, qkv_bias=False, key=None):
        self.dim = dim
        self.num_heads = num_heads
        self.head_dim = dim // num_heads
        if key is None:
            key = jax.random.PRNGKey(0)
        k1, k2, k3 = jax.random.split(key, 3)
        # deterministic synthetic init (qkv_bias=False like the reference);
        # weights stored [in, out] so y = x @ W + b.
        self.w_qkv = jax.random.normal(k1, (dim, 3 * dim), jnp.float32) * 0.05
        self.b_qkv = jnp.zeros((1, 3 * dim), jnp.float32)
        self.w_proj = jax.random.normal(k2, (dim, dim), jnp.float32) * 0.05
        self.b_proj = jax.random.normal(k3, (1, dim), jnp.float32) * 0.01

    def __call__(self, x, offsets, counts, batch_win_inds, batch_win_coords,
                 win_bev_shape, batch_size, indice_dict=None):
        n, c = x.shape
        h, d = self.num_heads, self.head_dim
        m = offsets.shape[0]

        # static per-window token capacity (tokens are contiguous per window)
        bmax = max(8, _round_up(int(jnp.max(counts)), 8))

        # fused QKV projection (+relu on q, k); three lane-dense [n, c] outputs
        wq, wk, wv = (self.w_qkv[:, :c], self.w_qkv[:, c:2 * c],
                      self.w_qkv[:, 2 * c:])
        bq, bk, bv = (self.b_qkv[:, :c], self.b_qkv[:, c:2 * c],
                      self.b_qkv[:, 2 * c:])
        q, k, v = qkv_linear_pallas(x, wq, wk, wv, bq, bk, bv)

        # scatter tokens into a zero-padded, head-major, per-window layout
        # [m, h, bmax, d] (XLA glue: the analogue of the Triton segment loads)
        wid = batch_win_inds.astype(jnp.int32)
        pos = jnp.arange(n, dtype=jnp.int32) - offsets.astype(jnp.int32)[wid]
        pad_idx = wid * bmax + pos

        def to_padded(t):
            buf = jnp.zeros((m * bmax, h, d), jnp.float32)
            buf = buf.at[pad_idx].set(t.reshape(n, h, d))
            return buf.reshape(m, bmax, h, d).transpose(0, 2, 1, 3)

        qp, kp, vp = to_padded(q), to_padded(k), to_padded(v)

        # per-window kv = relu(k)^T v  and  s = sum(relu(k))
        kv, s = scatter_kv_pallas(kp, vp)             # (m,h,d,d), (m,h,d)

        # SparseSumPool2d(3, 1, 1): densify window grid (glue), separable 3x3
        # sum pool in Pallas, gather back at the active sites.  kv (512 lanes,
        # lane-aligned) and s (32 lanes) are pooled as separate arrays.
        hb, wb = win_bev_shape
        bi = batch_win_coords[:, 0]
        yi = batch_win_coords[:, 1]
        xi = batch_win_coords[:, 2]
        f_kv, f_s = h * d * d, h * d
        dense_kv = jnp.zeros((batch_size, hb + 2, wb + 2, f_kv), jnp.float32)
        dense_kv = dense_kv.at[bi, yi + 1, xi + 1].set(kv.reshape(m, f_kv))
        dense_s = jnp.zeros((batch_size, hb + 2, wb + 2, f_s), jnp.float32)
        dense_s = dense_s.at[bi, yi + 1, xi + 1].set(s.reshape(m, f_s))
        pooled_kv_d, pooled_s_d = pool3x3_pallas(dense_kv, dense_s)
        kv_p = pooled_kv_d[bi, yi, xi].reshape(m, h, d, d)
        s_p = pooled_s_d[bi, yi, xi].reshape(m, h, d, 1)
        c_aug = jnp.concatenate([kv_p, s_p], axis=-1)  # (m, h, d, d+1)

        # fused y = relu(q) @ kv_pooled, z = <relu(q), s_pooled>, out = y/(z+eps)
        yp = scatter_qc_pallas(qp, c_aug)              # (m, h, bmax, d)

        # gather back to token order and project
        y = yp.transpose(0, 2, 1, 3).reshape(m * bmax, c)[pad_idx]
        y = linear_pallas(y, self.w_proj, self.b_proj)
        # TODO(synk): spconv indice_dict bookkeeping has no Pallas equivalent;
        # it is passed through unchanged.
        return y, indice_dict


# --------------------------- Pure-JAX reference ------------------------------

def reference_forward(module, x, offsets_np, counts_np, win_ids_np, coords_np):
    n, c = x.shape
    h, d = module.num_heads, module.head_dim
    m = len(offsets_np)
    qkv = jnp.dot(x, module.w_qkv, precision=HIGHEST) + module.b_qkv
    qkv = qkv.reshape(n, 3, c)
    q = jax.nn.relu(qkv[:, 0, :].reshape(n, h, d))
    k = jax.nn.relu(qkv[:, 1, :].reshape(n, h, d))
    v = qkv[:, 2, :].reshape(n, h, d)

    kv = jnp.zeros((m, h, d, d), jnp.float32)
    for w in range(m):
        o, cnt = int(offsets_np[w]), int(counts_np[w])
        if cnt > 0:
            kv = kv.at[w].set(jnp.einsum('nhd,nhe->hde', k[o:o + cnt],
                                         v[o:o + cnt], precision=HIGHEST))
    s = jnp.zeros((m, h, d), jnp.float32).at[jnp.asarray(win_ids_np)].add(k)

    feats_kv = np.asarray(kv.reshape(m, -1))
    feats_s = np.asarray(s.reshape(m, -1))
    p_kv = np.zeros_like(feats_kv)
    p_s = np.zeros_like(feats_s)
    for w in range(m):
        b0, y0, x0 = coords_np[w]
        for w2 in range(m):
            b1, y1, x1 = coords_np[w2]
            if (b0 == b1 and abs(int(y0) - int(y1)) <= 1
                    and abs(int(x0) - int(x1)) <= 1):
                p_kv[w] += feats_kv[w2]
                p_s[w] += feats_s[w2]
    kv_p = jnp.asarray(p_kv).reshape(m, h, d, d)
    s_p = jnp.asarray(p_s).reshape(m, h, d)

    y = jnp.zeros((n, h, d), jnp.float32)
    for w in range(m):
        o, cnt = int(offsets_np[w]), int(counts_np[w])
        if cnt > 0:
            y = y.at[o:o + cnt].set(jnp.einsum('nhd,hde->nhe', q[o:o + cnt],
                                               kv_p[w], precision=HIGHEST))
    z = jnp.sum(s_p[jnp.asarray(win_ids_np)] * q, -1, keepdims=True)
    y = y / (z + 1e-6)
    y = jnp.dot(y.reshape(n, c), module.w_proj, precision=HIGHEST) + module.b_proj
    return y


# --------------------------- main ---------------------------------------------

if __name__ == "__main__":
    dim = 32
    num_heads = 2
    n_points = 256
    m_wins = 16
    batch_size = 2
    win_bev_shape = (4, 4)

    counts_np = np.array([12, 20, 16, 0, 24, 8, 16, 16,
                          16, 32, 4, 12, 20, 16, 28, 16], np.int32)
    assert int(counts_np.sum()) == n_points
    offsets_np = np.concatenate([[0], np.cumsum(counts_np)[:-1]]).astype(np.int32)
    win_ids_np = np.repeat(np.arange(m_wins, dtype=np.int32), counts_np)
    coords_np = np.array([[w // 8, (w % 8) // 3, (w % 8) % 3]
                          for w in range(m_wins)], np.int32)

    key = jax.random.PRNGKey(0)
    k_param, k_x = jax.random.split(key)
    module = ScatterAttentionPallas(dim, num_heads, qkv_bias=False, key=k_param)
    x = jax.random.normal(k_x, (n_points, dim), jnp.float32)

    y, _ = module(x,
                  jnp.asarray(offsets_np), jnp.asarray(counts_np),
                  jnp.asarray(win_ids_np), jnp.asarray(coords_np),
                  win_bev_shape, batch_size, indice_dict=None)
    y = jax.block_until_ready(y)

    y_ref = reference_forward(module, x, offsets_np, counts_np, win_ids_np,
                              coords_np)
    np.testing.assert_allclose(np.asarray(y), np.asarray(y_ref),
                               rtol=2e-3, atol=2e-4)
    print("KERNEL_OK")
</pallas_src>

<mosaic_0001>
module attributes {stable_mosaic.version = 11 : i64} {
  func.func @_qkv_kernel(%arg0: i32, %arg1: memref<128x32xf32, #tpu.memory_space<vmem>>, %arg2: memref<32x32xf32, #tpu.memory_space<vmem>>, %arg3: memref<32x32xf32, #tpu.memory_space<vmem>>, %arg4: memref<32x32xf32, #tpu.memory_space<vmem>>, %arg5: memref<1x32xf32, #tpu.memory_space<vmem>>, %arg6: memref<1x32xf32, #tpu.memory_space<vmem>>, %arg7: memref<1x32xf32, #tpu.memory_space<vmem>>, %arg8: memref<128x32xf32, #tpu.memory_space<vmem>>, %arg9: memref<128x32xf32, #tpu.memory_space<vmem>>, %arg10: memref<128x32xf32, #tpu.memory_space<vmem>>) attributes {dimension_semantics = [#tpu.dimension_semantics<parallel>], iteration_bounds = array<i64: 2>, scalar_prefetch = 0 : i64, scratch_operands = 0 : i64, tpu.core_type = #tpu.core_type<tc>, window_params = [{transform_indices = @transform_0, window_bounds = array<i64: 128, 32>}, {pipeline_mode = #tpu.pipeline_mode<synchronous>, transform_indices = @transform_1, window_bounds = array<i64: 32, 32>}, {pipeline_mode = #tpu.pipeline_mode<synchronous>, transform_indices = @transform_2, window_bounds = array<i64: 32, 32>}, {pipeline_mode = #tpu.pipeline_mode<synchronous>, transform_indices = @transform_3, window_bounds = array<i64: 32, 32>}, {pipeline_mode = #tpu.pipeline_mode<synchronous>, transform_indices = @transform_4, window_bounds = array<i64: 1, 32>}, {pipeline_mode = #tpu.pipeline_mode<synchronous>, transform_indices = @transform_5, window_bounds = array<i64: 1, 32>}, {pipeline_mode = #tpu.pipeline_mode<synchronous>, transform_indices = @transform_6, window_bounds = array<i64: 1, 32>}, {transform_indices = @transform_7, window_bounds = array<i64: 128, 32>}, {transform_indices = @transform_8, window_bounds = array<i64: 128, 32>}, {transform_indices = @transform_9, window_bounds = array<i64: 128, 32>}]} {
    %c0 = arith.constant 0 : index
    %c0_0 = arith.constant 0 : index
    %0 = vector.load %arg1[%c0, %c0_0] : memref<128x32xf32, #tpu.memory_space<vmem>>, vector<128x32xf32>
    %c0_1 = arith.constant 0 : index
    %c0_2 = arith.constant 0 : index
    %1 = vector.load %arg2[%c0_1, %c0_2] : memref<32x32xf32, #tpu.memory_space<vmem>>, vector<32x32xf32>
    %cst = arith.constant dense<0.000000e+00> : vector<128x32xf32>
    %2 = tpu.matmul %0, %1, %cst {dimension_numbers = #tpu.dot_dimension_numbers<[1], [0], [0], [1], [0, 0, 1, 1], [], []>, precision = #tpu.contract_precision<fp32>} : vector<128x32xf32>, vector<32x32xf32>, vector<128x32xf32> -> vector<128x32xf32>
    %c0_3 = arith.constant 0 : index
    %c0_4 = arith.constant 0 : index
    %3 = vector.load %arg5[%c0_3, %c0_4] : memref<1x32xf32, #tpu.memory_space<vmem>>, vector<1x32xf32>
    %4 = vector.broadcast %3 : vector<1x32xf32> to vector<128x32xf32>
    %5 = arith.addf %2, %4 : vector<128x32xf32>
    %c0_5 = arith.constant 0 : index
    %c0_6 = arith.constant 0 : index
    %6 = vector.load %arg3[%c0_5, %c0_6] : memref<32x32xf32, #tpu.memory_space<vmem>>, vector<32x32xf32>
    %cst_7 = arith.constant dense<0.000000e+00> : vector<128x32xf32>
    %7 = tpu.matmul %0, %6, %cst_7 {dimension_numbers = #tpu.dot_dimension_numbers<[1], [0], [0], [1], [0, 0, 1, 1], [], []>, precision = #tpu.contract_precision<fp32>} : vector<128x32xf32>, vector<32x32xf32>, vector<128x32xf32> -> vector<128x32xf32>
    %c0_8 = arith.constant 0 : index
    %c0_9 = arith.constant 0 : index
    %8 = vector.load %arg6[%c0_8, %c0_9] : memref<1x32xf32, #tpu.memory_space<vmem>>, vector<1x32xf32>
    %9 = vector.broadcast %8 : vector<1x32xf32> to vector<128x32xf32>
    %10 = arith.addf %7, %9 : vector<128x32xf32>
    %c0_10 = arith.constant 0 : index
    %c0_11 = arith.constant 0 : index
    %11 = vector.load %arg4[%c0_10, %c0_11] : memref<32x32xf32, #tpu.memory_space<vmem>>, vector<32x32xf32>
    %cst_12 = arith.constant dense<0.000000e+00> : vector<128x32xf32>
    %12 = tpu.matmul %0, %11, %cst_12 {dimension_numbers = #tpu.dot_dimension_numbers<[1], [0], [0], [1], [0, 0, 1, 1], [], []>, precision = #tpu.contract_precision<fp32>} : vector<128x32xf32>, vector<32x32xf32>, vector<128x32xf32> -> vector<128x32xf32>
    %c0_13 = arith.constant 0 : index
    %c0_14 = arith.constant 0 : index
    %13 = vector.load %arg7[%c0_13, %c0_14] : memref<1x32xf32, #tpu.memory_space<vmem>>, vector<1x32xf32>
    %14 = vector.broadcast %13 : vector<1x32xf32> to vector<128x32xf32>
    %15 = arith.addf %12, %14 : vector<128x32xf32>
    %cst_15 = arith.constant 0.000000e+00 : f32
    %16 = vector.broadcast %cst_15 : f32 to vector<128x32xf32>
    %17 = arith.maximumf %5, %16 : vector<128x32xf32>
    %c0_16 = arith.constant 0 : index
    %c0_17 = arith.constant 0 : index
    %18 = vector.load %arg8[%c0_16, %c0_17] : memref<128x32xf32, #tpu.memory_space<vmem>>, vector<128x32xf32>
    tpu.vector_store %arg8[%c0_16, %c0_17], %17 {strides = array<i32>} : memref<128x32xf32, #tpu.memory_space<vmem>>, vector<128x32xf32>,
    %cst_18 = arith.constant 0.000000e+00 : f32
    %19 = vector.broadcast %cst_18 : f32 to vector<128x32xf32>
    %20 = arith.maximumf %10, %19 : vector<128x32xf32>
    %c0_19 = arith.constant 0 : index
    %c0_20 = arith.constant 0 : index
    %21 = vector.load %arg9[%c0_19, %c0_20] : memref<128x32xf32, #tpu.memory_space<vmem>>, vector<128x32xf32>
    tpu.vector_store %arg9[%c0_19, %c0_20], %20 {strides = array<i32>} : memref<128x32xf32, #tpu.memory_space<vmem>>, vector<128x32xf32>,
    %c0_21 = arith.constant 0 : index
    %c0_22 = arith.constant 0 : index
    %22 = vector.load %arg10[%c0_21, %c0_22] : memref<128x32xf32, #tpu.memory_space<vmem>>, vector<128x32xf32>
    tpu.vector_store %arg10[%c0_21, %c0_22], %15 {strides = array<i32>} : memref<128x32xf32, #tpu.memory_space<vmem>>, vector<128x32xf32>,
    return
  }
  func.func @transform_0(%arg0: i32) -> (i32, i32) {
    %c0_i32 = arith.constant 0 : i32
    %c0_i32_0 = arith.constant 0 : i32
    return %arg0, %c0_i32 : i32, i32
  }
  func.func @transform_1(%arg0: i32) -> (i32, i32) {
    %c0_i32 = arith.constant 0 : i32
    %c0_i32_0 = arith.constant 0 : i32
    %c0_i32_1 = arith.constant 0 : i32
    return %c0_i32, %c0_i32_0 : i32, i32
  }
  func.func @transform_2(%arg0: i32) -> (i32, i32) {
    %c0_i32 = arith.constant 0 : i32
    %c0_i32_0 = arith.constant 0 : i32
    %c0_i32_1 = arith.constant 0 : i32
    return %c0_i32, %c0_i32_0 : i32, i32
  }
  func.func @transform_3(%arg0: i32) -> (i32, i32) {
    %c0_i32 = arith.constant 0 : i32
    %c0_i32_0 = arith.constant 0 : i32
    %c0_i32_1 = arith.constant 0 : i32
    return %c0_i32, %c0_i32_0 : i32, i32
  }
  func.func @transform_4(%arg0: i32) -> (i32, i32) {
    %c0_i32 = arith.constant 0 : i32
    %c0_i32_0 = arith.constant 0 : i32
    %c0_i32_1 = arith.constant 0 : i32
    return %c0_i32, %c0_i32_0 : i32, i32
  }
  func.func @transform_5(%arg0: i32) -> (i32, i32) {
    %c0_i32 = arith.constant 0 : i32
    %c0_i32_0 = arith.constant 0 : i32
    %c0_i32_1 = arith.constant 0 : i32
    return %c0_i32, %c0_i32_0 : i32, i32
  }
  func.func @transform_6(%arg0: i32) -> (i32, i32) {
    %c0_i32 = arith.constant 0 : i32
    %c0_i32_0 = arith.constant 0 : i32
    %c0_i32_1 = arith.constant 0 : i32
    return %c0_i32, %c0_i32_0 : i32, i32
  }
  func.func @transform_7(%arg0: i32) -> (i32, i32) {
    %c0_i32 = arith.constant 0 : i32
    %c0_i32_0 = arith.constant 0 : i32
    return %arg0, %c0_i32 : i32, i32
  }
  func.func @transform_8(%arg0: i32) -> (i32, i32) {
    %c0_i32 = arith.constant 0 : i32
    %c0_i32_0 = arith.constant 0 : i32
    return %arg0, %c0_i32 : i32, i32
  }
  func.func @transform_9(%arg0: i32) -> (i32, i32) {
    %c0_i32 = arith.constant 0 : i32
    %c0_i32_0 = arith.constant 0 : i32
    return %arg0, %c0_i32 : i32, i32
  }
}

</mosaic_0001>

<bundles_post_ra>
// kernel: tpu_custom_call.1
= control target key start
LH: loop header
LB: loop body
LE: loop exit
PB: predicated region body
PF: predicated region fallthrough
CT: control target
= control target key end

     0   :  { %s5507_s30 = smov 0   ;;  %s6390_s0 = inlined_call_operand.vmem [shape: f32[256,32], index: 0, kind: input, shape index: {}]   ;;  %s6391_s1 = inlined_call_operand.vmem [shape: f32[32,32], index: 1, kind: input, shape index: {}]   ;;  %s6392_s2 = inlined_call_operand.vmem [shape: f32[32,32], index: 2, kind: input, shape index: {}]   ;;  %s6393_s3 = inlined_call_operand.vmem [shape: f32[32,32], index: 3, kind: input, shape index: {}]   ;;  %s6394_s4 = inlined_call_operand.vmem [shape: f32[1,32], index: 4, kind: input, shape index: {}]   ;;  %s6395_s5 = inlined_call_operand.vmem [shape: f32[1,32], index: 5, kind: input, shape index: {}]   ;;  %s6396_s6 = inlined_call_operand.vmem [shape: f32[1,32], index: 6, kind: input, shape index: {}]   ;;  %s6397_s7 = inlined_call_operand.vmem [shape: f32[256,32], index: 7, kind: output, shape index: {0}]   ;;  %s6398_s8 = inlined_call_operand.vmem [shape: f32[256,32], index: 8, kind: output, shape index: {1}]   ;;  %s6399_s9 = inlined_call_operand.vmem [shape: f32[256,32], index: 9, kind: output, shape index: {2}]  }
   0x1 LB: > { %s4055_s10 = sadd.s32 4294967295, %s5455_s30   ;;  %p4059_p0 = scmp.ge.s32.totalorder %s5455_s30, 1  ;;  %s5455_s30 = sphi %s5507_s30, %s20_s30  }
   0x2   : > { %p293_p1 = scmp.lt.s32.totalorder %s5455_s30, 3 }
   0x4   : > { %p294_p2 = pnand %p4059_p0, %p293_p1 }
   0x6   : > { %297 = sbr.rel (%p294_p2) target bundleno = 535 (0x217), region = 48 }
   0xd   : > { %v379_v0 = vld [vmem:[%s6391_s1] sm:$0xff]  ;;  %v380_v1 = vld [vmem:[%s6391_s1 + $0x8] sm:$0xff]  ;;  %v381_v2 = vld [vmem:[%s6391_s1 + $0x10] sm:$0xff]  ;;  %s4060_s17 = sshll.u32 %s4055_s10, 4  ;;  %vm390_vm0 = vcmask 261120  }
   0xe   : > { %v440_v3 = vand.u32 4294901760, %v379_v0  ;;  %v443_v4 = vand.u32 4294901760, %v380_v1  ;;  %v382_v5 = vld [vmem:[%s6391_s1 + $0x18] sm:$0xff]  ;;  %v446_v6 = vand.u32 4294901760, %v381_v2  ;;  %p340_p3 = scmp.lt.s32.totalorder %s4060_s17, 31 }
   0xf   : > { %v449_v7 = vand.u32 4294901760, %v382_v5 }
  0x10   : > { %v5527_v8 = vpack.c.bf16 %v443_v4, %v440_v3  ;;  %s6516_s17 = smov (!%p340_p3, %s4060_s17), 31  ;;  %v5529_v9 = vsub.f32 %v379_v0, %v440_v3  ;;  %v5531_v10 = vsub.f32 %v380_v1, %v443_v4  ;;  %v5533_v11 = vsub.f32 %v381_v2, %v446_v6 }
  0x11   : > { %v5535_v12 = vpack.c.bf16 %v449_v7, %v446_v6  ;;  %v5537_v13 = vsub.f32 %v382_v5, %v449_v7  ;;  %s5541_s20 = sshll.u32 %s6516_s17, 3 }
  0x12   : > { %5034 = vmatprep.subr.bf16.mxu0 %v5527_v8  ;;  %5010 = vmatprep.subr.bf16.mxu1 %v5527_v8  ;;  %v671_v14 = vand.u32 4294901760, %v5529_v9  ;;  %v678_v15 = vand.u32 4294901760, %v5531_v10  ;;  %v685_v16 = vand.u32 4294901760, %v5533_v11  ;;  %s5552_s23 = scalar_lea.vmem %s6390_s0, %s5541_s20  ;;  %s6217_s25 = scalar_lea.vmem %s6397_s7, %s5541_s20 }
  0x13   : > { %5036 = vmatpush3.bf16.msra.mxu0 %v5527_v8  ;;  %5012 = vmatpush3.bf16.msra.mxu1 %v5527_v8  ;;  %v363_v17 = vld [vmem:[%s5552_s23] sm:$0xff]  ;;  %v364_v18 = vld [vmem:[%s5552_s23 + $0x8] sm:$0xff]  ;;  %v365_v21 = vld [vmem:[%s5552_s23 + $0x10] sm:$0xff]  ;;  %v692_v23 = vand.u32 4294901760, %v5537_v13  ;;  %s6278_s10 = scalar_lea.vmem %s6399_s9, %s5541_s20  ;;  %s6297_s15 = scalar_lea.vmem %s6398_s8, %s5541_s20 }
  0x14   : > { %5038 = vmatprep.subr.bf16.mxu0 %v5535_v12  ;;  %5014 = vmatprep.subr.bf16.mxu1 %v5535_v12  ;;  %v672_v19 = vsub.f32 %v5529_v9, %v671_v14  ;;  %v679_v20 = vsub.f32 %v5531_v10, %v678_v15  ;;  %v5041_v22 = vpack.c.bf16 %v678_v15, %v671_v14  ;;  %v392_v24 = vsel %vm390_vm0, %v363_v17, 0  ;;  %v366_v27 = vld [vmem:[%s5552_s23 + $0x18] sm:$0xff]  ;;  %v367_v28 = vld [vmem:[%s5552_s23 + $0x20] sm:$0xff]  ;;  %v368_v29 = vld [vmem:[%s5552_s23 + $0x28] sm:$0xff] }
  0x15   : > { %v395_v25 = vsel %vm390_vm0, %v364_v18, 0  ;;  %v398_v26 = vsel %vm390_vm0, %v365_v21, 0  ;;  %v5571_v30 = vsub.f32 %v5533_v11, %v685_v16  ;;  %v5573_v31 = vand.u32 4294901760, %v392_v24  ;;  %v369_v35 = vld [vmem:[%s5552_s23 + $0x30] sm:$0xff]  ;;  %v370_v44 = vld [vmem:[%s5552_s23 + $0x38] sm:$0xff]  ;;  %v371_v1 = vld [vmem:[%s5552_s23 + $0x40] sm:$0xff] }
  0x16   : > { %v5575_v32 = vand.u32 4294901760, %v395_v25  ;;  %v673_v33 = vand.u32 4294901760, %v672_v19  ;;  %v680_v34 = vand.u32 4294901760, %v679_v20  ;;  %v5580_v36 = vand.u32 4294901760, %v398_v26  ;;  %v372_v2 = vld [vmem:[%s5552_s23 + $0x48] sm:$0xff]  ;;  %v373_v21 = vld [vmem:[%s5552_s23 + $0x50] sm:$0xff] }
  0x17   : > { %6457 = vst [vmem:[#allocation2_spill] sm:$0xff] %v5573_v31  ;;  %5040 = vmatpush3.bf16.msra.mxu0 %v5535_v12  ;;  %5016 = vmatpush3.bf16.msra.mxu1 %v5535_v12  ;;  %v401_v37 = vsel %vm390_vm0, %v366_v27, 0  ;;  %v404_v38 = vsel %vm390_vm0, %v367_v28, 0  ;;  %v407_v39 = vsel %vm390_vm0, %v368_v29, 0  ;;  %v5586_v40 = vsub.f32 %v392_v24, %v5573_v31 }
  0x18   : > { %v5589_v41 = vsub.f32 %v395_v25, %v5575_v32  ;;  %v5017_v42 = vpack.c.bf16 %v680_v34, %v673_v33  ;;  %v5591_v43 = vand.u32 4294901760, %v401_v37  ;;  %5042 = vmatprep.subr.bf16.mxu0 %v5041_v22  ;;  %v5595_v45 = vsub.f32 %v398_v26, %v5580_v36  ;;  %v375_v34 = vld [vmem:[%s5552_s23 + $0x60] sm:$0xff] }
  0x19   : > { %v5597_v46 = vand.u32 4294901760, %v404_v38  ;;  %v5599_v47 = vand.u32 4294901760, %v407_v39  ;;  %v410_v48 = vsel %vm390_vm0, %v369_v35, 0  ;;  %v5603_v49 = vand.u32 4294901760, %v5586_v40 }
  0x1a   : > { %v5606_v50 = vand.u32 4294901760, %v5589_v41  ;;  %5018 = vmatprep.subr.bf16.mxu1 %v5017_v42  ;;  %v5609_v51 = vsub.f32 %v401_v37, %v5591_v43  ;;  %v5611_v52 = vand.u32 4294901760, %v410_v48  ;;  %v5614_v53 = vand.u32 4294901760, %v5595_v45 }
  0x1b   : > { %6458 = vst [vmem:[#allocation3_spill] sm:$0xff] %v5603_v49  ;;  %v5617_v54 = vsub.f32 %v404_v38, %v5597_v46  ;;  %v5620_v55 = vsub.f32 %v407_v39, %v5599_v47  ;;  %v413_v56 = vsel %vm390_vm0, %v370_v44, 0  ;;  %4537 = vmatprep.mubr.f32.mxu0 %v5603_v49  ;;  %v511_v57 = vsub.f32 %v5586_v40, %v5603_v49  ;;  %v2713_v49 = vld [vmem:[%s6393_s3 + $0x18] sm:$0xff] }
  0x1c   : > { %6459 = vst [vmem:[#allocation4_spill] sm:$0xff] %v5606_v50  ;;  %6460 = vst [vmem:[#allocation5_spill] sm:$0xff] %v5614_v53  ;;  %v521_v58 = vsub.f32 %v5589_v41, %v5606_v50  ;;  %v5629_v59 = vand.u32 4294901760, %v5609_v51  ;;  %v5632_v60 = vsub.f32 %v410_v48, %v5611_v52  ;;  %4538 = vmatmul.mubr.f32.vlgmr.msra.gmra.mrb[0].mxu0 %v5606_v50  ;;  %v5643_v0 = vand.u32 4294901760, %v413_v56  ;;  %v2712_v50 = vld [vmem:[%s6393_s3 + $0x10] sm:$0xff] }
  0x1d   : > { %v531_v61 = vsub.f32 %v5595_v45, %v5614_v53  ;;  %v5638_v62 = vand.u32 4294901760, %v5617_v54  ;;  %v5641_v63 = vand.u32 4294901760, %v5620_v55  ;;  %v5647_v3 = vand.u32 4294901760, %v511_v57  ;;  %4540 = vmatprep.mubr.f32.mxu0 %v5614_v53  ;;  %5044 = vmatpush3.bf16.msra.mxu0 %v5041_v22  ;;  %v374_v22 = vld [vmem:[%s5552_s23 + $0x58] sm:$0xff]  ;;  %v377_v57 = vld [vmem:[%s5552_s23 + $0x70] sm:$0xff] }
  0x1e   : > { %6461 = vst [vmem:[#allocation6_spill] sm:$0xff] %v5629_v59  ;;  %v5650_v4 = vand.u32 4294901760, %v521_v58  ;;  %v541_v5 = vsub.f32 %v5609_v51, %v5629_v59  ;;  %v5655_v6 = vand.u32 4294901760, %v5632_v60  ;;  %v5664_v17 = vsub.f32 %v413_v56, %v5643_v0  ;;  %v376_v56 = vld [vmem:[%s5552_s23 + $0x68] sm:$0xff] }
  0x1f   : > { %6462 = vst [vmem:[#allocation7_spill] sm:$0xff] %v5638_v62  ;;  %6463 = vst [vmem:[#allocation8_spill] sm:$0xff] %v5641_v63  ;;  %v5657_v7 = vand.u32 4294901760, %v531_v61  ;;  %v551_v14 = vsub.f32 %v5617_v54, %v5638_v62  ;;  %v561_v15 = vsub.f32 %v5620_v55, %v5641_v63  ;;  %4441 = vmatprep.mubr.f32.mxu1 %v5647_v3  ;;  %v416_v19 = vsel %vm390_vm0, %v371_v1, 0 }
  0x20   : > { %6464 = vst [vmem:[#allocation9_spill] sm:$0xff] %v5655_v6  ;;  %v5667_v18 = vand.u32 4294901760, %v541_v5  ;;  %v419_v20 = vsel %vm390_vm0, %v372_v2, 0  ;;  %v5675_v24 = vpack.c.bf16 %v5531_v10, %v5529_v9  ;;  %4442 = vmatmul.mubr.f32.vlgmr.msra.gmra.mrb[0].mxu1 %v5650_v4  ;;  %4541 = vmatmul.mubr.f32.gmra.mrb[2].mxu0 %v5629_v59  ;;  %v5682_v26 = vand.u32 4294901760, %v5664_v17 }
  0x21   : > { %v5679_v25 = vand.u32 4294901760, %v551_v14  ;;  %v571_v27 = vsub.f32 %v5632_v60, %v5655_v6  ;;  %v5686_v28 = vand.u32 4294901760, %v416_v19  ;;  %5020 = vmatpush3.bf16.msra.mxu1 %v5017_v42  ;;  %4444 = vmatprep.mubr.f32.mxu1 %v5657_v7  ;;  %v5689_v9 = vand.u32 4294901760, %v561_v15 }
  0x22   : > { %6465 = vst [vmem:[#allocation10_spill] sm:$0xff] %v5682_v26  ;;  %v5691_v10 = vand.u32 4294901760, %v419_v20  ;;  %v687_v29 = vand.u32 4294901760, %v5571_v30  ;;  %v693_v33 = vsub.f32 %v5537_v13, %v692_v23  ;;  %4543 = vmatprep.mubr.f32.mxu0 %v5638_v62  ;;  %v581_v37 = vsub.f32 %v5664_v17, %v5682_v26 }
  0x23   : > { %6466 = vst [vmem:[#allocation11_spill] sm:$0xff] %v5689_v9  ;;  %v5700_v35 = vsub.f32 %v416_v19, %v5686_v28  ;;  %v422_v38 = vsel %vm390_vm0, %v373_v21, 0  ;;  %v425_v39 = vsel %vm390_vm0, %v374_v22, 0  ;;  %v5717_v58 = vand.u32 4294901760, %v571_v27 }
  0x24   : > { %v5707_v42 = vsub.f32 %v419_v20, %v5691_v10  ;;  %v694_v30 = vand.u32 4294901760, %v693_v33  ;;  %v5709_v44 = vand.u32 4294901760, %v422_v38  ;;  %v5711_v48 = vand.u32 4294901760, %v425_v39  ;;  %4445 = vmatmul.mubr.f32.gmra.mrb[2].mxu1 %v5667_v18  ;;  %4544 = vmatmul.mubr.f32.gmra.mrb[4].mxu0 %v5641_v63  ;;  %v378_v20 = vld [vmem:[%s5552_s23 + $0x78] sm:$0xff] }
  0x25   : > { %6467 = vst [vmem:[#allocation12_spill] sm:$0xff] %v5717_v58  ;;  %v5720_v61 = vand.u32 4294901760, %v5700_v35  ;;  %v5045_v1 = vpack.c.bf16 %v692_v23, %v685_v16  ;;  %v428_v2 = vsel %vm390_vm0, %v375_v34, 0  ;;  %4447 = vmatprep.mubr.f32.mxu1 %v5679_v25  ;;  %4546 = vmatprep.mubr.f32.mxu0 %v5655_v6  ;;  %v431_v21 = vsel %vm390_vm0, %v376_v56, 0 }
  0x26   : > { %v5730_v5 = vand.u32 4294901760, %v5707_v42  ;;  %v5021_v14 = vpack.c.bf16 %v694_v30, %v687_v29  ;;  %v5733_v15 = vsub.f32 %v422_v38, %v5709_v44  ;;  %v5736_v19 = vsub.f32 %v425_v39, %v5711_v48 }
  0x27   : > { %6468 = vst [vmem:[#allocation13_spill] sm:$0xff] %v5720_v61  ;;  %v591_v16 = vsub.f32 %v5700_v35, %v5720_v61  ;;  %5046 = vmatprep.subr.bf16.mxu0 %v5045_v1  ;;  %v5741_v23 = vand.u32 4294901760, %v428_v2  ;;  %v434_v22 = vsel %vm390_vm0, %v377_v57, 0  ;;  %v5745_v27 = vand.u32 4294901760, %v581_v37 }
  0x28   : > { %6469 = vst [vmem:[#allocation14_spill] sm:$0xff] %v5730_v5  ;;  %5022 = vmatprep.subr.bf16.mxu1 %v5021_v14  ;;  %v5748_v29 = vand.u32 4294901760, %v5733_v15  ;;  %v601_v33 = vsub.f32 %v5707_v42, %v5730_v5  ;;  %5048 = vmatpush3.bf16.msra.mxu0 %v5045_v1  ;;  %v5752_v34 = vand.u32 4294901760, %v431_v21  ;;  %v5757_v38 = vand.u32 4294901760, %v5736_v19 }
  0x29   : > { %6470 = vst [vmem:[#allocation15_spill] sm:$0xff] %v5745_v27  ;;  %4448 = vmatmul.mubr.f32.gmra.mrb[4].mxu1 %v5689_v9  ;;  %4547 = vmatmul.mubr.f32.gmra.mrb[6].mxu0 %v5682_v26  ;;  %v5760_v37 = vsub.f32 %v428_v2, %v5741_v23  ;;  %v5762_v39 = vand.u32 4294901760, %v434_v22  ;;  %v437_v30 = vsel %vm390_vm0, %v378_v20, 0  ;;  %v5767_v56 = vand.u32 4294901760, %v591_v16 }
  0x2a   : > { %6471 = vst [vmem:[#allocation16_spill] sm:$0xff] %v5748_v29  ;;  %6472 = vst [vmem:[#allocation17_spill] sm:$0xff] %v5757_v38  ;;  %4450 = vmatprep.mubr.f32.mxu1 %v5717_v58  ;;  %4549 = vmatprep.mubr.f32.mxu0 %v5720_v61  ;;  %v611_v57 = vsub.f32 %v5733_v15, %v5748_v29  ;;  %v5772_v1 = vsub.f32 %v431_v21, %v5752_v34  ;;  %v5780_v20 = vand.u32 4294901760, %v437_v30 }
  0x2b   : > { %6473 = vst [vmem:[#allocation18_spill] sm:$0xff] %v5767_v56  ;;  %5024 = vmatpush3.bf16.msra.mxu1 %v5021_v14  ;;  %v5775_v2 = vand.u32 4294901760, %v5760_v37  ;;  %v5778_v26 = vsub.f32 %v434_v22, %v5762_v39  ;;  %5050 = vmatprep.subr.bf16.mxu0 %v5527_v8  ;;  %v5786_v16 = vand.u32 4294901760, %v601_v33  ;;  %v621_v14 = vsub.f32 %v5736_v19, %v5757_v38 }
  0x2c   : > { %5026 = vmatprep.subr.bf16.mxu1 %v5675_v24  ;;  %v5791_v21 = vand.u32 4294901760, %v5772_v1  ;;  %v5794_v22 = vsub.f32 %v437_v30, %v5780_v20  ;;  %v5798_v61 = vand.u32 4294901760, %v611_v57 }
  0x2d   : > { %6474 = vst [vmem:[#allocation19_spill] sm:$0xff] %v5775_v2  ;;  %4451 = vmatmul.mubr.f32.gmra.mrb[6].mxu1 %v5745_v27  ;;  %4550 = vmatmul.mubr.f32.gmra.mrb[8].mxu0 %v5730_v5  ;;  %6475 = vst [vmem:[#allocation20_spill] sm:$0xff] %v5786_v16  ;;  %v631_v5 = vsub.f32 %v5760_v37, %v5775_v2  ;;  %v5803_v33 = vand.u32 4294901760, %v5778_v26  ;;  %v5807_v6 = vand.u32 4294901760, %v621_v14 }
  0x2e   : > { %6476 = vst [vmem:[#allocation21_spill] sm:$0xff] %v5791_v21  ;;  %4453 = vmatprep.mubr.f32.mxu1 %v5767_v56  ;;  %4552 = vmatprep.mubr.f32.mxu0 %v5748_v29  ;;  %6477 = vst [vmem:[#allocation22_spill] sm:$0xff] %v5798_v61  ;;  %v641_v30 = vsub.f32 %v5772_v1, %v5791_v21  ;;  %v5812_v63 = vand.u32 4294901760, %v5794_v22 }
  0x2f   : > { %6478 = vst [vmem:[#allocation23_spill] sm:$0xff] %v5803_v33  ;;  %6479 = vst [vmem:[#allocation24_spill] sm:$0xff] %v5807_v6  ;;  %v5816_v57 = vand.u32 4294901760, %v631_v5  ;;  %v651_v29 = vsub.f32 %v5778_v26, %v5803_v33 }
  0x30   : > { %6480 = vst [vmem:[#allocation25_spill] sm:$0xff] %v5812_v63  ;;  %v5822_v14 = vand.u32 4294901760, %v641_v30  ;;  %v2710_v30 = vld [vmem:[%s6393_s3] sm:$0xff] }
  0x31   : > { %4454 = vmatmul.mubr.f32.gmra.mrb[8].mxu1 %v5786_v16  ;;  %4553 = vmatmul.mubr.f32.gmra.mrb[10].mxu0 %v5757_v38  ;;  %6481 = vst [vmem:[#allocation26_spill] sm:$0xff] %v5816_v57  ;;  %v661_v38 = vsub.f32 %v5794_v22, %v5812_v63  ;;  %v5828_v62 = vand.u32 4294901760, %v651_v29  ;;  %v1569_v29 = vld [vmem:[%s6392_s2] sm:$0xff] }
  0x32   : > { %4456 = vmatprep.mubr.f32.mxu1 %v5798_v61  ;;  %4555 = vmatprep.mubr.f32.mxu0 %v5775_v2  ;;  %6482 = vst [vmem:[#allocation27_spill] sm:$0xff] %v5822_v14  ;;  %v1581_v59 = vand.u32 4294901760, %v1569_v29 }
  0x33   : > { %6483 = vst [vmem:[#allocation28_spill] sm:$0xff] %v5828_v62  ;;  %v5832_v5 = vand.u32 4294901760, %v661_v38  ;;  %v1570_v38 = vld [vmem:[%s6392_s2 + $0x8] sm:$0xff] }
  0x34   : > { %v1584_v53 = vand.u32 4294901760, %v1570_v38 }
  0x35   : > { %4457 = vmatmul.mubr.f32.gmra.mrb[10].mxu1 %v5807_v6  ;;  %4556 = vmatmul.mubr.f32.gmra.mrb[12].mxu0 %v5791_v21  ;;  %6484 = vst [vmem:[#allocation29_spill] sm:$0xff] %v5832_v5  ;;  %v2722_v21 = vand.u32 4294901760, %v2710_v30 }
  0x36   : > { %4459 = vmatprep.mubr.f32.mxu1 %v5816_v57  ;;  %4558 = vmatprep.mubr.f32.mxu0 %v5803_v33  ;;  %v2711_v33 = vld [vmem:[%s6393_s3 + $0x8] sm:$0xff] }
  0x37   : > { %v2725_v2 = vand.u32 4294901760, %v2711_v33 }
  0x39   : > { %4460 = vmatmul.mubr.f32.gmra.mrb[12].mxu1 %v5822_v14  ;;  %4559 = vmatmul.mubr.f32.gmra.mrb[14].mxu0 %v5812_v63  ;;  %v5029_v63 = vpack.c.bf16 %v5537_v13, %v5533_v11  ;;  %v5864_v11 = vpack.c.bf16 %v1584_v53, %v1581_v59  ;;  %v5886_v13 = vsub.f32 %v2711_v33, %v2725_v2  ;;  %v2728_v33 = vand.u32 4294901760, %v2712_v50 }
  0x3a   : > { %4462 = vmatprep.mubr.f32.mxu1 %v5828_v62  ;;  %4569 = vmatprep.mubr.f32.mxu0 %v5573_v31 }
  0x3d   : > { %4463 = vmatmul.mubr.f32.gmra.mrb[14].mxu1 %v5832_v5  ;;  %4570 = vmatmul.mubr.f32.vlgmr.msra.gmra.mrb[0].mxu0 %v5575_v32 }
  0x3e   : > { %4473 = vmatprep.mubr.f32.mxu1 %v5573_v31  ;;  %4572 = vmatprep.mubr.f32.mxu0 %v5580_v36 }
  0x3f   : > { %5052 = vmatpush3.bf16.msra.mxu0 %v5527_v8  ;;  %v5861_v8 = vpack.c.bf16 %v2725_v2, %v2722_v21  ;;  %v1571_v2 = vld [vmem:[%s6392_s2 + $0x10] sm:$0xff] }
  0x40   : > { %5054 = vmatprep.subr.bf16.mxu0 %v5535_v12  ;;  %v1587_v5 = vand.u32 4294901760, %v1571_v2 }
  0x41   : > { %4474 = vmatmul.mubr.f32.vlgmr.msra.gmra.mrb[0].mxu1 %v5575_v32  ;;  %4573 = vmatmul.mubr.f32.gmra.mrb[2].mxu0 %v5591_v43 }
  0x42   : > { %5028 = vmatpush3.bf16.msra.mxu1 %v5675_v24  ;;  %4476 = vmatprep.mubr.f32.mxu1 %v5580_v36  ;;  %v5890_v24 = vsub.f32 %v1570_v38, %v1584_v53  ;;  %v2960_v53 = vand.u32 4294901760, %v5886_v13 }
  0x43   : > { %4575 = vmatprep.mubr.f32.mxu0 %v5597_v46  ;;  %5030 = vmatprep.subr.bf16.mxu1 %v5029_v63 }
  0x44   : > { %5056 = vmatpush3.bf16.msra.mxu0 %v5535_v12  ;;  %v5884_v12 = vsub.f32 %v2710_v30, %v2722_v21  ;;  %6485 = vst [vmem:[#allocation30_spill] sm:$0xff] %v5890_v24  ;;  %v1572_v21 = vld [vmem:[%s6392_s2 + $0x18] sm:$0xff]  ;;  %v2731_v30 = vand.u32 4294901760, %v2713_v49  ;;  %v1819_v38 = vand.u32 4294901760, %v5890_v24  ;;  %v2961_v57 = vsub.f32 %v5886_v13, %v2960_v53 }
  0x45   : > { %4477 = vmatmul.mubr.f32.gmra.mrb[2].mxu1 %v5591_v43  ;;  %4576 = vmatmul.mubr.f32.gmra.mrb[4].mxu0 %v5599_v47  ;;  %v1590_v62 = vand.u32 4294901760, %v1572_v21 }
  0x46   : > { %4479 = vmatprep.mubr.f32.mxu1 %v5597_v46  ;;  %4578 = vmatprep.mubr.f32.mxu0 %v5611_v52  ;;  %v5918_v6 = vpack.c.bf16 %v2731_v30, %v2728_v33  ;;  %v1820_v16 = vsub.f32 %v5890_v24, %v1819_v38  ;;  %v2962_v58 = vand.u32 4294901760, %v2961_v57 }
  0x47   : > { %5032 = vmatpush3.bf16.msra.mxu1 %v5029_v63  ;;  %5106 = vmatprep.subr.bf16.mxu0 %v5861_v8  ;;  %v5888_v63 = vsub.f32 %v1569_v29, %v1581_v59  ;;  %v2953_v59 = vand.u32 4294901760, %v5884_v12  ;;  %v5929_v56 = vpack.c.bf16 %v1590_v62, %v1587_v5 }
  0x48   : > { %5058 = vmatprep.subr.bf16.mxu1 %v5864_v11  ;;  %v1821_v24 = vand.u32 4294901760, %v1820_v16  ;;  %v5948_v16 = vsub.f32 %v1572_v21, %v1590_v62 }
  0x49   : > { %4480 = vmatmul.mubr.f32.gmra.mrb[4].mxu1 %v5599_v47  ;;  %4579 = vmatmul.mubr.f32.gmra.mrb[6].mxu0 %v5643_v0  ;;  %v1812_v29 = vand.u32 4294901760, %v5888_v63  ;;  %v2954_v14 = vsub.f32 %v5884_v12, %v2953_v59 }
  0x4a   : > { %4482 = vmatprep.mubr.f32.mxu1 %v5611_v52  ;;  %4581 = vmatprep.mubr.f32.mxu0 %v5686_v28 }
  0x4b   : > { %v1813_v61 = vsub.f32 %v5888_v63, %v1812_v29  ;;  %v2955_v27 = vand.u32 4294901760, %v2954_v14 }
  0x4d   : > { %4483 = vmatmul.mubr.f32.gmra.mrb[6].mxu1 %v5643_v0  ;;  %4582 = vmatmul.mubr.f32.gmra.mrb[8].mxu0 %v5691_v10  ;;  %v1814_v9 = vand.u32 4294901760, %v1813_v61  ;;  %v5113_v14 = vpack.c.bf16 %v2962_v58, %v2955_v27  ;;  %v5946_v61 = vsub.f32 %v1571_v2, %v1587_v5  ;;  %v5956_v58 = vsub.f32 %v2713_v49, %v2731_v30 }
  0x4e   : > { %4485 = vmatprep.mubr.f32.mxu1 %v5686_v28  ;;  %4584 = vmatprep.mubr.f32.mxu0 %v5709_v44 }
  0x4f   : > { %v5065_v57 = vpack.c.bf16 %v1821_v24, %v1814_v9  ;;  %v5954_v9 = vsub.f32 %v2712_v50, %v2728_v33  ;;  %v1826_v27 = vand.u32 4294901760, %v5946_v61  ;;  %v1833_v24 = vand.u32 4294901760, %v5948_v16 }
  0x50   : > { %v2974_v50 = vand.u32 4294901760, %v5956_v58 }
  0x51   : > { %4486 = vmatmul.mubr.f32.gmra.mrb[8].mxu1 %v5691_v10  ;;  %4585 = vmatmul.mubr.f32.gmra.mrb[10].mxu0 %v5711_v48  ;;  %v5964_v62 = vpack.c.bf16 %v1833_v24, %v1826_v27  ;;  %v2967_v5 = vand.u32 4294901760, %v5954_v9  ;;  %v1827_v2 = vsub.f32 %v5946_v61, %v1826_v27  ;;  %v1834_v21 = vsub.f32 %v5948_v16, %v1833_v24 }
  0x52   : > { %4488 = vmatprep.mubr.f32.mxu1 %v5709_v44  ;;  %4587 = vmatprep.mubr.f32.mxu0 %v5741_v23  ;;  %v5121_v24 = vpack.c.bf16 %v5886_v13, %v5884_v12  ;;  %v6490_v12 = vld [vmem:[#allocation18_spill] sm:$0xff]  ;;  %v6493_v13 = vld [vmem:[#allocation24_spill] sm:$0xff] }
  0x53   : > { %v5970_v49 = vpack.c.bf16 %v2974_v50, %v2967_v5 }
  0x55   : > { %4489 = vmatmul.mubr.f32.gmra.mrb[10].mxu1 %v5711_v48  ;;  %4588 = vmatmul.mubr.f32.gmra.mrb[12].mxu0 %v5752_v34 }
  0x56   : > { %4491 = vmatprep.mubr.f32.mxu1 %v5741_v23  ;;  %4590 = vmatprep.mubr.f32.mxu0 %v5762_v39 }
  0x59   : > { %4492 = vmatmul.mubr.f32.gmra.mrb[12].mxu1 %v5752_v34  ;;  %4591 = vmatmul.mubr.f32.gmra.mrb[14].mxu0 %v5780_v20 }
  0x5a   : > { %4494 = vmatprep.mubr.f32.mxu1 %v5762_v39  ;;  %4601 = vmatprep.mubr.f32.mxu0 %v5573_v31  ;;  %v5926_v31 = vpack.c.bf16 %v1819_v38, %v1812_v29  ;;  %v5936_v29 = vpack.c.bf16 %v2960_v53, %v2953_v59  ;;  %v2968_v59 = vsub.f32 %v5954_v9, %v2967_v5  ;;  %v1828_v38 = vand.u32 4294901760, %v1827_v2  ;;  %v6497_v2 = vld [vmem:[#allocation29_spill] sm:$0xff] }
  0x5b   : > { %v2975_v53 = vsub.f32 %v5956_v58, %v2974_v50  ;;  %v1835_v5 = vand.u32 4294901760, %v1834_v21  ;;  %v6498_v21 = vld [vmem:[#allocation2_spill] sm:$0xff] }
  0x5c   : > { %v2969_v33 = vand.u32 4294901760, %v2968_v59 }
  0x5d   : > { %4495 = vmatmul.mubr.f32.gmra.mrb[14].mxu1 %v5780_v20  ;;  %4602 = vmatmul.mubr.f32.vlgmr.msra.gmra.mrb[0].mxu0 %v5575_v32  ;;  %v2976_v30 = vand.u32 4294901760, %v2975_v53  ;;  %v5069_v27 = vpack.c.bf16 %v1835_v5, %v1828_v38  ;;  %v6496_v53 = vld [vmem:[#allocation28_spill] sm:$0xff] }
  0x5e   : > { %4505 = vmatprep.mubr.f32.mxu1 %v5586_v40  ;;  %4604 = vmatprep.mubr.f32.mxu0 %v5580_v36 }
  0x5f   : > { %5108 = vmatpush3.bf16.msra.mxu0 %v5861_v8  ;;  %v5117_v50 = vpack.c.bf16 %v2976_v30, %v2969_v33  ;;  %v5125_v33 = vpack.c.bf16 %v5956_v58, %v5954_v9  ;;  %v5077_v30 = vpack.c.bf16 %v5948_v16, %v5946_v61 }
  0x60   : > { %5110 = vmatprep.subr.bf16.mxu0 %v5918_v6 }
  0x61   : > { %4506 = vmatmul.mubr.f32.vlgmr.msra.gmra.mrb[0].mxu1 %v5589_v41  ;;  %4605 = vmatmul.mubr.f32.gmra.mrb[2].mxu0 %v5591_v43 }
  0x62   : > { %5060 = vmatpush3.bf16.msra.mxu1 %v5864_v11  ;;  %4508 = vmatprep.mubr.f32.mxu1 %v5595_v45 }
  0x63   : > { %4607 = vmatprep.mubr.f32.mxu0 %v5597_v46  ;;  %5062 = vmatprep.subr.bf16.mxu1 %v5929_v56 }
  0x64   : > { %5112 = vmatpush3.bf16.msra.mxu0 %v5918_v6 }
  0x65   : > { %4509 = vmatmul.mubr.f32.gmra.mrb[2].mxu1 %v5609_v51  ;;  %4608 = vmatmul.mubr.f32.gmra.mrb[4].mxu0 %v5599_v47 }
  0x66   : > { %4511 = vmatprep.mubr.f32.mxu1 %v5617_v54  ;;  %4610 = vmatprep.mubr.f32.mxu0 %v5611_v52 }
  0x67   : > { %5064 = vmatpush3.bf16.msra.mxu1 %v5929_v56  ;;  %5114 = vmatprep.subr.bf16.mxu0 %v5113_v14 }
  0x68   : > { %5066 = vmatprep.subr.bf16.mxu1 %v5065_v57 }
  0x69   : > { %4512 = vmatmul.mubr.f32.gmra.mrb[4].mxu1 %v5620_v55  ;;  %4611 = vmatmul.mubr.f32.gmra.mrb[6].mxu0 %v5643_v0 }
  0x6a   : > { %4514 = vmatprep.mubr.f32.mxu1 %v5632_v60  ;;  %4613 = vmatprep.mubr.f32.mxu0 %v5686_v28 }
  0x6d   : > { %4515 = vmatmul.mubr.f32.gmra.mrb[6].mxu1 %v5664_v17  ;;  %4614 = vmatmul.mubr.f32.gmra.mrb[8].mxu0 %v5691_v10 }
  0x6e   : > { %4517 = vmatprep.mubr.f32.mxu1 %v5700_v35  ;;  %4616 = vmatprep.mubr.f32.mxu0 %v5709_v44 }
  0x71   : > { %4518 = vmatmul.mubr.f32.gmra.mrb[8].mxu1 %v5707_v42  ;;  %4617 = vmatmul.mubr.f32.gmra.mrb[10].mxu0 %v5711_v48 }
  0x72   : > { %4520 = vmatprep.mubr.f32.mxu1 %v5733_v15  ;;  %4619 = vmatprep.mubr.f32.mxu0 %v5741_v23 }
  0x75   : > { %4521 = vmatmul.mubr.f32.gmra.mrb[10].mxu1 %v5736_v19  ;;  %4620 = vmatmul.mubr.f32.gmra.mrb[12].mxu0 %v5752_v34 }
  0x76   : > { %4523 = vmatprep.mubr.f32.mxu1 %v5760_v37  ;;  %4622 = vmatprep.mubr.f32.mxu0 %v5762_v39 }
  0x79   : > { %4524 = vmatmul.mubr.f32.gmra.mrb[12].mxu1 %v5772_v1  ;;  %4623 = vmatmul.mubr.f32.gmra.mrb[14].mxu0 %v5780_v20 }
  0x7a   : > { %4526 = vmatprep.mubr.f32.mxu1 %v5778_v26  ;;  %4825 = vmatprep.mubr.f32.mxu0 %v5647_v3 }
  0x7d   : > { %4527 = vmatmul.mubr.f32.gmra.mrb[14].mxu1 %v5794_v22  ;;  %4826 = vmatmul.mubr.f32.vlgmr.msra.gmra.mrb[16].mxu0 %v5650_v4 }
  0x7e   : > { %4633 = vmatprep.mubr.f32.mxu1 %v5647_v3  ;;  %4828 = vmatprep.mubr.f32.mxu0 %v5657_v7  ;;  %v6486_v3 = vld [vmem:[#allocation30_spill] sm:$0xff] }
  0x7f   : > { %5116 = vmatpush3.bf16.msra.mxu0 %v5113_v14  ;;  %v5073_v59 = vpack.c.bf16 %v6486_v3, %v5888_v63  ;;  %v6487_v14 = vld [vmem:[#allocation11_spill] sm:$0xff]  ;;  %v6494_v63 = vld [vmem:[#allocation26_spill] sm:$0xff] }
  0x80   : > { %5118 = vmatprep.subr.bf16.mxu0 %v5117_v50 }
  0x81   : > { %4634 = vmatmul.mubr.f32.vlgmr.msra.gmra.mrb[16].mxu1 %v5650_v4  ;;  %4829 = vmatmul.mubr.f32.gmra.mrb[18].mxu0 %v5667_v18  ;;  %v6488_v4 = vld [vmem:[#allocation12_spill] sm:$0xff] }
  0x82   : > { %5068 = vmatpush3.bf16.msra.mxu1 %v5065_v57  ;;  %4636 = vmatprep.mubr.f32.mxu1 %v5657_v7  ;;  %v6489_v7 = vld [vmem:[#allocation15_spill] sm:$0xff] }
  0x83   : > { %4831 = vmatprep.mubr.f32.mxu0 %v5679_v25  ;;  %5070 = vmatprep.subr.bf16.mxu1 %v5069_v27  ;;  %v6495_v57 = vld [vmem:[#allocation27_spill] sm:$0xff] }
  0x84   : > { %5120 = vmatpush3.bf16.msra.mxu0 %v5117_v50 }
  0x85   : > { %4637 = vmatmul.mubr.f32.gmra.mrb[18].mxu1 %v5667_v18  ;;  %4832 = vmatmul.mubr.f32.gmra.mrb[20].mxu0 %v6487_v14  ;;  %v6491_v18 = vld [vmem:[#allocation20_spill] sm:$0xff] }
  0x86   : > { %4639 = vmatprep.mubr.f32.mxu1 %v5679_v25  ;;  %4834 = vmatprep.mubr.f32.mxu0 %v6488_v4  ;;  %v6492_v25 = vld [vmem:[#allocation22_spill] sm:$0xff] }
  0x87   : > { %5072 = vmatpush3.bf16.msra.mxu1 %v5069_v27  ;;  %5122 = vmatprep.subr.bf16.mxu0 %v5121_v24 }
  0x88   : > { %5074 = vmatprep.subr.bf16.mxu1 %v5073_v59 }
  0x89   : > { %4640 = vmatmul.mubr.f32.gmra.mrb[20].mxu1 %v6487_v14  ;;  %4835 = vmatmul.mubr.f32.gmra.mrb[22].mxu0 %v6489_v7 }
  0x8a   : > { %4642 = vmatprep.mubr.f32.mxu1 %v6488_v4  ;;  %4837 = vmatprep.mubr.f32.mxu0 %v6490_v12 }
  0x8d   : > { %4643 = vmatmul.mubr.f32.gmra.mrb[22].mxu1 %v6489_v7  ;;  %4838 = vmatmul.mubr.f32.gmra.mrb[24].mxu0 %v6491_v18 }
  0x8e   : > { %4645 = vmatprep.mubr.f32.mxu1 %v6490_v12  ;;  %4840 = vmatprep.mubr.f32.mxu0 %v6492_v25 }
  0x91   : > { %4646 = vmatmul.mubr.f32.gmra.mrb[24].mxu1 %v6491_v18  ;;  %4841 = vmatmul.mubr.f32.gmra.mrb[26].mxu0 %v6493_v13 }
  0x92   : > { %4648 = vmatprep.mubr.f32.mxu1 %v6492_v25  ;;  %4843 = vmatprep.mubr.f32.mxu0 %v6494_v63 }
  0x95   : > { %4649 = vmatmul.mubr.f32.gmra.mrb[26].mxu1 %v6493_v13  ;;  %4844 = vmatmul.mubr.f32.gmra.mrb[28].mxu0 %v6495_v57 }
  0x96   : > { %4651 = vmatprep.mubr.f32.mxu1 %v6494_v63  ;;  %4846 = vmatprep.mubr.f32.mxu0 %v6496_v53 }
  0x99   : > { %4652 = vmatmul.mubr.f32.gmra.mrb[28].mxu1 %v6495_v57  ;;  %4847 = vmatmul.mubr.f32.gmra.mrb[30].mxu0 %v6497_v2 }
  0x9a   : > { %4654 = vmatprep.mubr.f32.mxu1 %v6496_v53  ;;  %4857 = vmatprep.mubr.f32.mxu0 %v6498_v21 }
  0x9d   : > { %4655 = vmatmul.mubr.f32.gmra.mrb[30].mxu1 %v6497_v2  ;;  %4858 = vmatmul.mubr.f32.vlgmr.msra.gmra.mrb[16].mxu0 %v5575_v32 }
  0x9e   : > { %4665 = vmatprep.mubr.f32.mxu1 %v6498_v21  ;;  %4860 = vmatprep.mubr.f32.mxu0 %v5580_v36 }
  0x9f   : > { %5124 = vmatpush3.bf16.msra.mxu0 %v5121_v24 }
  0xa0   : > { %5126 = vmatprep.subr.bf16.mxu0 %v5125_v33 }
  0xa1   : > { %4666 = vmatmul.mubr.f32.vlgmr.msra.gmra.mrb[16].mxu1 %v5575_v32  ;;  %4861 = vmatmul.mubr.f32.gmra.mrb[18].mxu0 %v5591_v43 }
  0xa2   : > { %5076 = vmatpush3.bf16.msra.mxu1 %v5073_v59  ;;  %4668 = vmatprep.mubr.f32.mxu1 %v5580_v36 }
  0xa3   : > { %4863 = vmatprep.mubr.f32.mxu0 %v5597_v46  ;;  %5078 = vmatprep.subr.bf16.mxu1 %v5077_v30 }
  0xa4   : > { %5128 = vmatpush3.bf16.msra.mxu0 %v5125_v33 }
  0xa5   : > { %4669 = vmatmul.mubr.f32.gmra.mrb[18].mxu1 %v5591_v43  ;;  %4864 = vmatmul.mubr.f32.gmra.mrb[20].mxu0 %v5599_v47 }
  0xa6   : > { %4671 = vmatprep.mubr.f32.mxu1 %v5597_v46  ;;  %4866 = vmatprep.mubr.f32.mxu0 %v5611_v52 }
  0xa7   : > { %5080 = vmatpush3.bf16.msra.mxu1 %v5077_v30  ;;  %5130 = vmatprep.subr.bf16.mxu0 %v5861_v8 }
  0xa8   : > { %5082 = vmatprep.subr.bf16.mxu1 %v5864_v11 }
  0xa9   : > { %4672 = vmatmul.mubr.f32.gmra.mrb[20].mxu1 %v5599_v47  ;;  %4867 = vmatmul.mubr.f32.gmra.mrb[22].mxu0 %v5643_v0 }
  0xaa   : > { %4674 = vmatprep.mubr.f32.mxu1 %v5611_v52  ;;  %4869 = vmatprep.mubr.f32.mxu0 %v5686_v28 }
  0xad   : > { %4675 = vmatmul.mubr.f32.gmra.mrb[22].mxu1 %v5643_v0  ;;  %4870 = vmatmul.mubr.f32.gmra.mrb[24].mxu0 %v5691_v10 }
  0xae   : > { %4677 = vmatprep.mubr.f32.mxu1 %v5686_v28  ;;  %4872 = vmatprep.mubr.f32.mxu0 %v5709_v44 }
  0xb1   : > { %4678 = vmatmul.mubr.f32.gmra.mrb[24].mxu1 %v5691_v10  ;;  %4873 = vmatmul.mubr.f32.gmra.mrb[26].mxu0 %v5711_v48 }
  0xb2   : > { %4680 = vmatprep.mubr.f32.mxu1 %v5709_v44  ;;  %4875 = vmatprep.mubr.f32.mxu0 %v5741_v23 }
  0xb5   : > { %4681 = vmatmul.mubr.f32.gmra.mrb[26].mxu1 %v5711_v48  ;;  %4876 = vmatmul.mubr.f32.gmra.mrb[28].mxu0 %v5752_v34 }
  0xb6   : > { %4683 = vmatprep.mubr.f32.mxu1 %v5741_v23  ;;  %4878 = vmatprep.mubr.f32.mxu0 %v5762_v39 }
  0xb9   : > { %4684 = vmatmul.mubr.f32.gmra.mrb[28].mxu1 %v5752_v34  ;;  %4879 = vmatmul.mubr.f32.gmra.mrb[30].mxu0 %v5780_v20 }
  0xba   : > { %4686 = vmatprep.mubr.f32.mxu1 %v5762_v39  ;;  %4889 = vmatprep.mubr.f32.mxu0 %v5586_v40 }
  0xbd   : > { %4687 = vmatmul.mubr.f32.gmra.mrb[30].mxu1 %v5780_v20  ;;  %4890 = vmatmul.mubr.f32.vlgmr.msra.gmra.mrb[16].mxu0 %v5589_v41 }
  0xbe   : > { %4697 = vmatprep.mubr.f32.mxu1 %v5586_v40  ;;  %4892 = vmatprep.mubr.f32.mxu0 %v5595_v45  ;;  %v6499_v40 = vld [vmem:[#allocation3_spill] sm:$0xff] }
  0xbf   : > { %5132 = vmatpush3.bf16.msra.mxu0 %v5861_v8 }
  0xc0   : > { %5134 = vmatprep.subr.bf16.mxu0 %v5918_v6 }
  0xc1   : > { %4698 = vmatmul.mubr.f32.vlgmr.msra.gmra.mrb[16].mxu1 %v5589_v41  ;;  %4893 = vmatmul.mubr.f32.gmra.mrb[18].mxu0 %v5609_v51  ;;  %v6500_v41 = vld [vmem:[#allocation4_spill] sm:$0xff] }
  0xc2   : > { %5084 = vmatpush3.bf16.msra.mxu1 %v5864_v11  ;;  %4700 = vmatprep.mubr.f32.mxu1 %v5595_v45  ;;  %v6501_v45 = vld [vmem:[#allocation5_spill] sm:$0xff] }
  0xc3   : > { %4895 = vmatprep.mubr.f32.mxu0 %v5617_v54  ;;  %5086 = vmatprep.subr.bf16.mxu1 %v5929_v56 }
  0xc4   : > { %5136 = vmatpush3.bf16.msra.mxu0 %v5918_v6 }
  0xc5   : > { %4701 = vmatmul.mubr.f32.gmra.mrb[18].mxu1 %v5609_v51  ;;  %4896 = vmatmul.mubr.f32.gmra.mrb[20].mxu0 %v5620_v55  ;;  %v6502_v51 = vld [vmem:[#allocation6_spill] sm:$0xff] }
  0xc6   : > { %4703 = vmatprep.mubr.f32.mxu1 %v5617_v54  ;;  %4898 = vmatprep.mubr.f32.mxu0 %v5632_v60  ;;  %v6503_v54 = vld [vmem:[#allocation7_spill] sm:$0xff] }
  0xc7   : > { %5088 = vmatpush3.bf16.msra.mxu1 %v5929_v56  ;;  %5138 = vmatprep.subr.bf16.mxu0 %v5936_v29 }
  0xc8   : > { %5090 = vmatprep.subr.bf16.mxu1 %v5926_v31 }
  0xc9   : > { %4704 = vmatmul.mubr.f32.gmra.mrb[20].mxu1 %v5620_v55  ;;  %4899 = vmatmul.mubr.f32.gmra.mrb[22].mxu0 %v5664_v17  ;;  %v6504_v55 = vld [vmem:[#allocation8_spill] sm:$0xff] }
  0xca   : > { %4706 = vmatprep.mubr.f32.mxu1 %v5632_v60  ;;  %4901 = vmatprep.mubr.f32.mxu0 %v5700_v35  ;;  %v6505_v60 = vld [vmem:[#allocation9_spill] sm:$0xff] }
  0xcd   : > { %4707 = vmatmul.mubr.f32.gmra.mrb[22].mxu1 %v5664_v17  ;;  %4902 = vmatmul.mubr.f32.gmra.mrb[24].mxu0 %v5707_v42  ;;  %v6507_v17 = vld [vmem:[#allocation13_spill] sm:$0xff] }
  0xce   : > { %4709 = vmatprep.mubr.f32.mxu1 %v5700_v35  ;;  %4904 = vmatprep.mubr.f32.mxu0 %v5733_v15  ;;  %v6509_v35 = vld [vmem:[#allocation16_spill] sm:$0xff] }
  0xd1   : > { %4710 = vmatmul.mubr.f32.gmra.mrb[24].mxu1 %v5707_v42  ;;  %4905 = vmatmul.mubr.f32.gmra.mrb[26].mxu0 %v5736_v19  ;;  %v6510_v42 = vld [vmem:[#allocation17_spill] sm:$0xff] }
  0xd2   : > { %4712 = vmatprep.mubr.f32.mxu1 %v5733_v15  ;;  %4907 = vmatprep.mubr.f32.mxu0 %v5760_v37  ;;  %v6511_v15 = vld [vmem:[#allocation19_spill] sm:$0xff] }
  0xd5   : > { %4713 = vmatmul.mubr.f32.gmra.mrb[26].mxu1 %v5736_v19  ;;  %4908 = vmatmul.mubr.f32.gmra.mrb[28].mxu0 %v5772_v1  ;;  %v6512_v19 = vld [vmem:[#allocation21_spill] sm:$0xff] }
  0xd6   : > { %4715 = vmatprep.mubr.f32.mxu1 %v5760_v37  ;;  %4910 = vmatprep.mubr.f32.mxu0 %v5778_v26  ;;  %v6513_v37 = vld [vmem:[#allocation23_spill] sm:$0xff] }
  0xd9   : > { %4716 = vmatmul.mubr.f32.gmra.mrb[28].mxu1 %v5772_v1  ;;  %4911 = vmatmul.mubr.f32.gmra.mrb[30].mxu0 %v5794_v22  ;;  %v6514_v1 = vld [vmem:[#allocation25_spill] sm:$0xff] }
  0xda   : > { %4718 = vmatprep.mubr.f32.mxu1 %v5778_v26  ;;  %4921 = vmatprep.mubr.f32.mxu0 %v6499_v40  ;;  %v6508_v26 = vld [vmem:[#allocation14_spill] sm:$0xff] }
  0xdd   : > { %4719 = vmatmul.mubr.f32.gmra.mrb[30].mxu1 %v5794_v22  ;;  %4922 = vmatmul.mubr.f32.vlgmr.msra.gmra.mrb[16].mxu0 %v6500_v41 }
  0xde   : > { %4729 = vmatprep.mubr.f32.mxu1 %v6499_v40  ;;  %4924 = vmatprep.mubr.f32.mxu0 %v6501_v45 }
  0xdf   : > { %5140 = vmatpush3.bf16.msra.mxu0 %v5936_v29 }
  0xe0   : > { %5142 = vmatprep.subr.bf16.mxu0 %v5970_v49 }
  0xe1   : > { %4730 = vmatmul.mubr.f32.vlgmr.msra.gmra.mrb[16].mxu1 %v6500_v41  ;;  %4925 = vmatmul.mubr.f32.gmra.mrb[18].mxu0 %v6502_v51 }
  0xe2   : > { %5092 = vmatpush3.bf16.msra.mxu1 %v5926_v31  ;;  %4732 = vmatprep.mubr.f32.mxu1 %v6501_v45  ;;  %v6506_v31 = vld [vmem:[#allocation10_spill] sm:$0xff] }
  0xe3   : > { %4927 = vmatprep.mubr.f32.mxu0 %v6503_v54  ;;  %5094 = vmatprep.subr.bf16.mxu1 %v5964_v62 }
  0xe4   : > { %5144 = vmatpush3.bf16.msra.mxu0 %v5970_v49 }
  0xe5   : > { %4733 = vmatmul.mubr.f32.gmra.mrb[18].mxu1 %v6502_v51  ;;  %4928 = vmatmul.mubr.f32.gmra.mrb[20].mxu0 %v6504_v55 }
  0xe6   : > { %4735 = vmatprep.mubr.f32.mxu1 %v6503_v54  ;;  %4930 = vmatprep.mubr.f32.mxu0 %v6505_v60 }
  0xe7   : > { %5096 = vmatpush3.bf16.msra.mxu1 %v5964_v62  ;;  %5146 = vmatprep.subr.bf16.mxu0 %v5861_v8 }
  0xe8   : > { %5098 = vmatprep.subr.bf16.mxu1 %v5864_v11 }
  0xe9   : > { %4736 = vmatmul.mubr.f32.gmra.mrb[20].mxu1 %v6504_v55  ;;  %4931 = vmatmul.mubr.f32.gmra.mrb[22].mxu0 %v6506_v31 }
  0xea   : > { %4738 = vmatprep.mubr.f32.mxu1 %v6505_v60  ;;  %4933 = vmatprep.mubr.f32.mxu0 %v6507_v17 }
  0xed   : > { %4739 = vmatmul.mubr.f32.gmra.mrb[22].mxu1 %v6506_v31  ;;  %4934 = vmatmul.mubr.f32.gmra.mrb[24].mxu0 %v6508_v26 }
  0xee   : > { %4741 = vmatprep.mubr.f32.mxu1 %v6507_v17  ;;  %4936 = vmatprep.mubr.f32.mxu0 %v6509_v35 }
  0xf1   : > { %4742 = vmatmul.mubr.f32.gmra.mrb[24].mxu1 %v6508_v26  ;;  %4937 = vmatmul.mubr.f32.gmra.mrb[26].mxu0 %v6510_v42 }
  0xf2   : > { %4744 = vmatprep.mubr.f32.mxu1 %v6509_v35  ;;  %4939 = vmatprep.mubr.f32.mxu0 %v6511_v15 }
  0xf5   : > { %4745 = vmatmul.mubr.f32.gmra.mrb[26].mxu1 %v6510_v42  ;;  %4940 = vmatmul.mubr.f32.gmra.mrb[28].mxu0 %v6512_v19 }
  0xf6   : > { %4747 = vmatprep.mubr.f32.mxu1 %v6511_v15  ;;  %4942 = vmatprep.mubr.f32.mxu0 %v6513_v37 }
  0xf9   : > { %4748 = vmatmul.mubr.f32.gmra.mrb[28].mxu1 %v6512_v19  ;;  %4943 = vmatmul.mubr.f32.gmra.mrb[30].mxu0 %v6514_v1 }
  0xfa   : > { %4750 = vmatprep.mubr.f32.mxu1 %v6513_v37  ;;  %4953 = vmatprep.mubr.f32.mxu0 %v6498_v21 }
  0xfd   : > { %4751 = vmatmul.mubr.f32.gmra.mrb[30].mxu1 %v6514_v1  ;;  %4954 = vmatmul.mubr.f32.vlgmr.msra.gmra.mrb[16].mxu0 %v5575_v32 }
  0xfe   : > { %4761 = vmatprep.mubr.f32.mxu1 %v6498_v21  ;;  %4956 = vmatprep.mubr.f32.mxu0 %v5580_v36 }
  0xff   : > { %5148 = vmatpush3.bf16.msra.mxu0 %v5861_v8 }
 0x100   : > { %5150 = vmatprep.subr.bf16.mxu0 %v5918_v6 }
 0x101   : > { %4762 = vmatmul.mubr.f32.vlgmr.msra.gmra.mrb[16].mxu1 %v5575_v32  ;;  %4957 = vmatmul.mubr.f32.gmra.mrb[18].mxu0 %v5591_v43 }
 0x102   : > { %5100 = vmatpush3.bf16.msra.mxu1 %v5864_v11  ;;  %4764 = vmatprep.mubr.f32.mxu1 %v5580_v36 }
 0x103   : > { %4959 = vmatprep.mubr.f32.mxu0 %v5597_v46  ;;  %5102 = vmatprep.subr.bf16.mxu1 %v5929_v56 }
 0x104   : > { %5152 = vmatpush3.bf16.msra.mxu0 %v5918_v6 }
 0x105   : > { %4765 = vmatmul.mubr.f32.gmra.mrb[18].mxu1 %v5591_v43  ;;  %4960 = vmatmul.mubr.f32.gmra.mrb[20].mxu0 %v5599_v47 }
 0x106   : > { %4767 = vmatprep.mubr.f32.mxu1 %v5597_v46  ;;  %4962 = vmatprep.mubr.f32.mxu0 %v5611_v52 }
 0x107   : > { %5104 = vmatpush3.bf16.msra.mxu1 %v5929_v56 }
 0x109   : > { %4768 = vmatmul.mubr.f32.gmra.mrb[20].mxu1 %v5599_v47  ;;  %4963 = vmatmul.mubr.f32.gmra.mrb[22].mxu0 %v5643_v0 }
 0x10a   : > { %4770 = vmatprep.mubr.f32.mxu1 %v5611_v52  ;;  %4965 = vmatprep.mubr.f32.mxu0 %v5686_v28 }
 0x10d   : > { %4771 = vmatmul.mubr.f32.gmra.mrb[22].mxu1 %v5643_v0  ;;  %4966 = vmatmul.mubr.f32.gmra.mrb[24].mxu0 %v5691_v10 }
 0x10e   : > { %4773 = vmatprep.mubr.f32.mxu1 %v5686_v28  ;;  %4968 = vmatprep.mubr.f32.mxu0 %v5709_v44 }
 0x111   : > { %4774 = vmatmul.mubr.f32.gmra.mrb[24].mxu1 %v5691_v10  ;;  %4969 = vmatmul.mubr.f32.gmra.mrb[26].mxu0 %v5711_v48 }
 0x112   : > { %4776 = vmatprep.mubr.f32.mxu1 %v5709_v44  ;;  %4971 = vmatprep.mubr.f32.mxu0 %v5741_v23 }
 0x115   : > { %4777 = vmatmul.mubr.f32.gmra.mrb[26].mxu1 %v5711_v48  ;;  %4972 = vmatmul.mubr.f32.gmra.mrb[28].mxu0 %v5752_v34 }
 0x116   : > { %4779 = vmatprep.mubr.f32.mxu1 %v5741_v23  ;;  %4974 = vmatprep.mubr.f32.mxu0 %v5762_v39 }
 0x119   : > { %4780 = vmatmul.mubr.f32.gmra.mrb[28].mxu1 %v5752_v34  ;;  %4975 = vmatmul.mubr.f32.gmra.mrb[30].mxu0 %v5780_v20 }
 0x11a   : > { %4782 = vmatprep.mubr.f32.mxu1 %v5762_v39  ;;  %4985 = vmatprep.mubr.f32.mxu0 %v6498_v21 }
 0x11d   : > { %4783 = vmatmul.mubr.f32.gmra.mrb[30].mxu1 %v5780_v20  ;;  %4986 = vmatmul.mubr.f32.vlgmr.msra.gmra.mrb[16].mxu0 %v5575_v32 }
 0x11e   : > { %4793 = vmatprep.mubr.f32.mxu1 %v6498_v21  ;;  %4988 = vmatprep.mubr.f32.mxu0 %v5580_v36 }
 0x121   : > { %4794 = vmatmul.mubr.f32.vlgmr.msra.gmra.mrb[16].mxu1 %v5575_v32  ;;  %4989 = vmatmul.mubr.f32.gmra.mrb[18].mxu0 %v5591_v43 }
 0x122   : > { %4796 = vmatprep.mubr.f32.mxu1 %v5580_v36  ;;  %4991 = vmatprep.mubr.f32.mxu0 %v5597_v46 }
 0x125   : > { %4797 = vmatmul.mubr.f32.gmra.mrb[18].mxu1 %v5591_v43  ;;  %4992 = vmatmul.mubr.f32.gmra.mrb[20].mxu0 %v5599_v47  ;;  %v6203_v43 = vld [vmem:[%s6394_s4] ss:$0 sm:$0xff] }
 0x126   : > { %4799 = vmatprep.mubr.f32.mxu1 %v5597_v46  ;;  %4994 = vmatprep.mubr.f32.mxu0 %v5611_v52 }
 0x129   : > { %4800 = vmatmul.mubr.f32.gmra.mrb[20].mxu1 %v5599_v47  ;;  %4995 = vmatmul.mubr.f32.gmra.mrb[22].mxu0 %v5643_v0 }
 0x12a   : > { %4802 = vmatprep.mubr.f32.mxu1 %v5611_v52  ;;  %4997 = vmatprep.mubr.f32.mxu0 %v5686_v28 }
 0x12d   : > { %4803 = vmatmul.mubr.f32.gmra.mrb[22].mxu1 %v5643_v0  ;;  %4998 = vmatmul.mubr.f32.gmra.mrb[24].mxu0 %v5691_v10 }
 0x12e   : > { %4805 = vmatprep.mubr.f32.mxu1 %v5686_v28  ;;  %5000 = vmatprep.mubr.f32.mxu0 %v5709_v44 }
 0x130   : > { %v4603_v32 = vpop.f32.mrb[0].mxu0 }
 0x131   : > { %v1475_v36 = vpop.f32.mrb[1].mxu0  ;;  %4806 = vmatmul.mubr.f32.gmra.mrb[24].mxu1 %v5691_v10  ;;  %5001 = vmatmul.mubr.f32.gmra.mrb[26].mxu0 %v5711_v48 }
 0x132   : > { %4808 = vmatprep.mubr.f32.mxu1 %v5709_v44  ;;  %5003 = vmatprep.mubr.f32.mxu0 %v5741_v23 }
 0x134   : > { %v4507_v46 = vpop.f32.mrb[0].mxu1  ;;  %v4606_v47 = vpop.f32.mrb[2].mxu0 }
 0x135   : > { %v5153_v52 = vadd.f32 %v4507_v46, %v6203_v43  ;;  %v925_v0 = vpop.f32.mrb[1].mxu1  ;;  %v1487_v6 = vpop.f32.mrb[3].mxu0  ;;  %4809 = vmatmul.mubr.f32.gmra.mrb[26].mxu1 %v5711_v48  ;;  %5004 = vmatmul.mubr.f32.gmra.mrb[28].mxu0 %v5752_v34 }
 0x136   : > { %v5155_v28 = vadd.f32 %v6203_v43, %v925_v0  ;;  %4811 = vmatprep.mubr.f32.mxu1 %v5741_v23  ;;  %5006 = vmatprep.mubr.f32.mxu0 %v5762_v39 }
 0x137   : > { %v5154_v10 = vadd.f32 %v5153_v52, %v4603_v32 }
 0x138   : > { %v5156_v44 = vadd.f32 %v5155_v28, %v1475_v36  ;;  %v4510_v56 = vpop.f32.mrb[2].mxu1  ;;  %v4609_v22 = vpop.f32.mrb[4].mxu0 }
 0x139   : > { %v3852_v48 = vmax.f32 %v5154_v10, 0.0  ;;  %v5157_v8 = vadd.f32 %v4510_v56, %v6203_v43  ;;  %v939_v11 = vpop.f32.mrb[3].mxu1  ;;  %v1499_v29 = vpop.f32.mrb[5].mxu0  ;;  %4812 = vmatmul.mubr.f32.gmra.mrb[28].mxu1 %v5752_v34  ;;  %5007 = vmatmul.mubr.f32.gmra.mrb[30].mxu0 %v5780_v20 }
 0x13a   : > { %v3851_v23 = vmax.f32 %v5156_v44, 0.0  ;;  %v5159_v61 = vadd.f32 %v6203_v43, %v939_v11  ;;  %4814 = vmatprep.mubr.f32.mxu1 %v5762_v39 }
 0x13b   : > { %3868 = vst.msk [vmem:[%s6217_s25 + $0x8] sm:$0xff] %vm390_vm0, %v3852_v48  ;;  %v5158_v16 = vadd.f32 %v5157_v8, %v4606_v47 }
 0x13c   : > { %3867 = vst.msk [vmem:[%s6217_s25] sm:$0xff] %vm390_vm0, %v3851_v23  ;;  %v5160_v9 = vadd.f32 %v5159_v61, %v1487_v6  ;;  %v4513_v58 = vpop.f32.mrb[4].mxu1  ;;  %v4612_v62 = vpop.f32.mrb[6].mxu0  ;;  %v6272_v61 = vld [vmem:[%s6396_s6] ss:$0 sm:$0xff] }
 0x13d   : > { %v3854_v49 = vmax.f32 %v5158_v16, 0.0  ;;  %v5161_v34 = vadd.f32 %v4513_v58, %v6203_v43  ;;  %v953_v38 = vpop.f32.mrb[5].mxu1  ;;  %v1511_v5 = vpop.f32.mrb[7].mxu0  ;;  %4815 = vmatmul.mubr.f32.gmra.mrb[30].mxu1 %v5780_v20 }
 0x13e   : > { %v3853_v50 = vmax.f32 %v5160_v9, 0.0  ;;  %v5163_v39 = vadd.f32 %v6203_v43, %v953_v38 }
 0x13f   : > { %3870 = vst.msk [vmem:[%s6217_s25 + $0x18] sm:$0xff] %vm390_vm0, %v3854_v49  ;;  %v5162_v27 = vadd.f32 %v5161_v34, %v4609_v22 }
 0x140   : > { %3869 = vst.msk [vmem:[%s6217_s25 + $0x10] sm:$0xff] %vm390_vm0, %v3853_v50  ;;  %v5164_v24 = vadd.f32 %v5163_v39, %v1499_v29  ;;  %v4516_v3 = vpop.f32.mrb[6].mxu1  ;;  %v4615_v59 = vpop.f32.mrb[8].mxu0 }
 0x141   : > { %v3856_v14 = vmax.f32 %v5162_v27, 0.0  ;;  %v5165_v4 = vadd.f32 %v4516_v3, %v6203_v43  ;;  %v967_v7 = vpop.f32.mrb[7].mxu1  ;;  %v1523_v12 = vpop.f32.mrb[9].mxu0 }
 0x142   : > { %v3855_v18 = vmax.f32 %v5164_v24, 0.0  ;;  %v5167_v20 = vadd.f32 %v6203_v43, %v967_v7 }
 0x143   : > { %3872 = vst.msk [vmem:[%s6217_s25 + $0x28] sm:$0xff] %vm390_vm0, %v3856_v14  ;;  %v5166_v25 = vadd.f32 %v5165_v4, %v4612_v62  ;;  %v6285_v62 = vld [vmem:[%s6395_s5] ss:$0 sm:$0xff] }
 0x144   : > { %3871 = vst.msk [vmem:[%s6217_s25 + $0x20] sm:$0xff] %vm390_vm0, %v3855_v18  ;;  %v5168_v13 = vadd.f32 %v5167_v20, %v1511_v5  ;;  %v4519_v63 = vpop.f32.mrb[8].mxu1  ;;  %v4618_v57 = vpop.f32.mrb[10].mxu0 }
 0x145   : > { %v3858_v53 = vmax.f32 %v5166_v25, 0.0  ;;  %v5169_v2 = vadd.f32 %v4519_v63, %v6203_v43  ;;  %v981_v21 = vpop.f32.mrb[9].mxu1  ;;  %v1535_v33 = vpop.f32.mrb[11].mxu0 }
 0x146   : > { %v3857_v30 = vmax.f32 %v5168_v13, 0.0  ;;  %v5171_v40 = vadd.f32 %v6203_v43, %v981_v21 }
 0x147   : > { %3874 = vst.msk [vmem:[%s6217_s25 + $0x38] sm:$0xff] %vm390_vm0, %v3858_v53  ;;  %v5170_v41 = vadd.f32 %v5169_v2, %v4615_v59 }
 0x148   : > { %3873 = vst.msk [vmem:[%s6217_s25 + $0x30] sm:$0xff] %vm390_vm0, %v3857_v30  ;;  %v5172_v45 = vadd.f32 %v5171_v40, %v1523_v12  ;;  %v4522_v51 = vpop.f32.mrb[10].mxu1  ;;  %v4621_v54 = vpop.f32.mrb[12].mxu0 }
 0x149   : > { %v3860_v55 = vmax.f32 %v5170_v41, 0.0  ;;  %v5173_v60 = vadd.f32 %v4522_v51, %v6203_v43  ;;  %v995_v31 = vpop.f32.mrb[11].mxu1  ;;  %v1547_v17 = vpop.f32.mrb[13].mxu0 }
 0x14a   : > { %v3859_v26 = vmax.f32 %v5172_v45, 0.0  ;;  %v5175_v35 = vadd.f32 %v6203_v43, %v995_v31 }
 0x14b   : > { %3876 = vst.msk [vmem:[%s6217_s25 + $0x48] sm:$0xff] %vm390_vm0, %v3860_v55  ;;  %v5174_v42 = vadd.f32 %v5173_v60, %v4618_v57 }
 0x14c   : > { %3875 = vst.msk [vmem:[%s6217_s25 + $0x40] sm:$0xff] %vm390_vm0, %v3859_v26  ;;  %v5176_v15 = vadd.f32 %v5175_v35, %v1535_v33  ;;  %v4525_v19 = vpop.f32.mrb[12].mxu1  ;;  %v4624_v37 = vpop.f32.mrb[14].mxu0 }
 0x14d   : > { %v3862_v1 = vmax.f32 %v5174_v42, 0.0  ;;  %v5177_v32 = vadd.f32 %v4525_v19, %v6203_v43  ;;  %v1009_v36 = vpop.f32.mrb[13].mxu1  ;;  %v1559_v46 = vpop.f32.mrb[15].mxu0 }
 0x14e   : > { %v3861_v47 = vmax.f32 %v5176_v15, 0.0  ;;  %v5179_v52 = vadd.f32 %v6203_v43, %v1009_v36 }
 0x14f   : > { %3878 = vst.msk [vmem:[%s6217_s25 + $0x58] sm:$0xff] %vm390_vm0, %v3862_v1  ;;  %v5178_v0 = vadd.f32 %v5177_v32, %v4621_v54 }
 0x150   : > { %3877 = vst.msk [vmem:[%s6217_s25 + $0x50] sm:$0xff] %vm390_vm0, %v3861_v47  ;;  %v5180_v6 = vadd.f32 %v5179_v52, %v1547_v17  ;;  %v4528_v28 = vpop.f32.mrb[14].mxu1 }
 0x151   : > { %v3864_v10 = vmax.f32 %v5178_v0, 0.0  ;;  %v5181_v44 = vadd.f32 %v4528_v28, %v6203_v43  ;;  %v1023_v56 = vpop.f32.mrb[15].mxu1 }
 0x152   : > { %v3863_v22 = vmax.f32 %v5180_v6, 0.0  ;;  %v5183_v48 = vadd.f32 %v6203_v43, %v1023_v56 }
 0x153   : > { %3880 = vst.msk [vmem:[%s6217_s25 + $0x68] sm:$0xff] %vm390_vm0, %v3864_v10  ;;  %v5182_v8 = vadd.f32 %v5181_v44, %v4624_v37 }
 0x154   : > { %3879 = vst.msk [vmem:[%s6217_s25 + $0x60] sm:$0xff] %vm390_vm0, %v3863_v22  ;;  %v5184_v11 = vadd.f32 %v5183_v48, %v1559_v46 }
 0x155   : > { %v3866_v29 = vmax.f32 %v5182_v8, 0.0 }
 0x156   : > { %v3865_v23 = vmax.f32 %v5184_v11, 0.0 }
 0x157   : > { %3882 = vst.msk [vmem:[%s6217_s25 + $0x78] sm:$0xff] %vm390_vm0, %v3866_v29 }
 0x158   : > { %3881 = vst.msk [vmem:[%s6217_s25 + $0x70] sm:$0xff] %vm390_vm0, %v3865_v23 }
 0x1f0   : > { %v4987_v43 = vpop.f32.mrb[16].mxu0 }
 0x1f1   : > { %v5201_v16 = vadd.f32 %v4987_v43, %v6272_v61  ;;  %v3757_v9 = vpop.f32.mrb[17].mxu0 }
 0x1f2   : > { %v5202_v58 = vadd.f32 %v6272_v61, %v3757_v9 }
 0x1f3   : > { %3916 = vst.msk [vmem:[%s6278_s10 + $0x8] sm:$0xff] %vm390_vm0, %v5201_v16 }
 0x1f4   : > { %3915 = vst.msk [vmem:[%s6278_s10] sm:$0xff] %vm390_vm0, %v5202_v58  ;;  %v4795_v49 = vpop.f32.mrb[16].mxu1  ;;  %v4990_v34 = vpop.f32.mrb[18].mxu0 }
 0x1f5   : > { %v5185_v38 = vadd.f32 %v4795_v49, %v6285_v62  ;;  %v5203_v5 = vadd.f32 %v4990_v34, %v6272_v61  ;;  %v2616_v50 = vpop.f32.mrb[17].mxu1  ;;  %v3769_v39 = vpop.f32.mrb[19].mxu0 }
 0x1f6   : > { %v5186_v27 = vadd.f32 %v6285_v62, %v2616_v50  ;;  %v5204_v24 = vadd.f32 %v6272_v61, %v3769_v39 }
 0x1f7   : > { %v3884_v3 = vmax.f32 %v5185_v38, 0.0  ;;  %3918 = vst.msk [vmem:[%s6278_s10 + $0x18] sm:$0xff] %vm390_vm0, %v5203_v5 }
 0x1f8   : > { %v3883_v59 = vmax.f32 %v5186_v27, 0.0  ;;  %3917 = vst.msk [vmem:[%s6278_s10 + $0x10] sm:$0xff] %vm390_vm0, %v5204_v24  ;;  %v4798_v14 = vpop.f32.mrb[18].mxu1  ;;  %v4993_v4 = vpop.f32.mrb[20].mxu0 }
 0x1f9   : > { %3900 = vst.msk [vmem:[%s6297_s15 + $0x8] sm:$0xff] %vm390_vm0, %v3884_v3  ;;  %v5187_v7 = vadd.f32 %v4798_v14, %v6285_v62  ;;  %v5205_v12 = vadd.f32 %v4993_v4, %v6272_v61  ;;  %v2628_v18 = vpop.f32.mrb[19].mxu1  ;;  %v3781_v20 = vpop.f32.mrb[21].mxu0 }
 0x1fa   : > { %3899 = vst.msk [vmem:[%s6297_s15] sm:$0xff] %vm390_vm0, %v3883_v59  ;;  %v5188_v25 = vadd.f32 %v6285_v62, %v2628_v18  ;;  %v5206_v13 = vadd.f32 %v6272_v61, %v3781_v20 }
 0x1fb   : > { %v3886_v63 = vmax.f32 %v5187_v7, 0.0  ;;  %3920 = vst.msk [vmem:[%s6278_s10 + $0x28] sm:$0xff] %vm390_vm0, %v5205_v12 }
 0x1fc   : > { %v3885_v57 = vmax.f32 %v5188_v25, 0.0  ;;  %3919 = vst.msk [vmem:[%s6278_s10 + $0x20] sm:$0xff] %vm390_vm0, %v5206_v13  ;;  %v4801_v53 = vpop.f32.mrb[20].mxu1  ;;  %v4996_v2 = vpop.f32.mrb[22].mxu0 }
 0x1fd   : > { %3902 = vst.msk [vmem:[%s6297_s15 + $0x18] sm:$0xff] %vm390_vm0, %v3886_v63  ;;  %v5189_v21 = vadd.f32 %v4801_v53, %v6285_v62  ;;  %v5207_v33 = vadd.f32 %v4996_v2, %v6272_v61  ;;  %v2640_v30 = vpop.f32.mrb[21].mxu1  ;;  %v3793_v40 = vpop.f32.mrb[23].mxu0 }
 0x1fe   : > { %3901 = vst.msk [vmem:[%s6297_s15 + $0x10] sm:$0xff] %vm390_vm0, %v3885_v57  ;;  %v5190_v41 = vadd.f32 %v6285_v62, %v2640_v30  ;;  %v5208_v45 = vadd.f32 %v6272_v61, %v3793_v40 }
 0x1ff   : > { %v3888_v51 = vmax.f32 %v5189_v21, 0.0  ;;  %3922 = vst.msk [vmem:[%s6278_s10 + $0x38] sm:$0xff] %vm390_vm0, %v5207_v33 }
 0x200   : > { %v3887_v54 = vmax.f32 %v5190_v41, 0.0  ;;  %3921 = vst.msk [vmem:[%s6278_s10 + $0x30] sm:$0xff] %vm390_vm0, %v5208_v45  ;;  %v4804_v55 = vpop.f32.mrb[22].mxu1  ;;  %v4999_v60 = vpop.f32.mrb[24].mxu0 }
 0x201   : > { %3904 = vst.msk [vmem:[%s6297_s15 + $0x28] sm:$0xff] %vm390_vm0, %v3888_v51  ;;  %v5191_v31 = vadd.f32 %v4804_v55, %v6285_v62  ;;  %v5209_v17 = vadd.f32 %v4999_v60, %v6272_v61  ;;  %v2652_v26 = vpop.f32.mrb[23].mxu1  ;;  %v3805_v35 = vpop.f32.mrb[25].mxu0 }
 0x202   : > { %3903 = vst.msk [vmem:[%s6297_s15 + $0x20] sm:$0xff] %vm390_vm0, %v3887_v54  ;;  %v5192_v42 = vadd.f32 %v6285_v62, %v2652_v26  ;;  %v5210_v15 = vadd.f32 %v6272_v61, %v3805_v35 }
 0x203   : > { %v3890_v19 = vmax.f32 %v5191_v31, 0.0  ;;  %3924 = vst.msk [vmem:[%s6278_s10 + $0x48] sm:$0xff] %vm390_vm0, %v5209_v17 }
 0x204   : > { %v3889_v37 = vmax.f32 %v5192_v42, 0.0  ;;  %3923 = vst.msk [vmem:[%s6278_s10 + $0x40] sm:$0xff] %vm390_vm0, %v5210_v15  ;;  %v4807_v1 = vpop.f32.mrb[24].mxu1  ;;  %v5002_v32 = vpop.f32.mrb[26].mxu0 }
 0x205   : > { %3906 = vst.msk [vmem:[%s6297_s15 + $0x38] sm:$0xff] %vm390_vm0, %v3890_v19  ;;  %v5193_v36 = vadd.f32 %v4807_v1, %v6285_v62  ;;  %v5211_v46 = vadd.f32 %v5002_v32, %v6272_v61  ;;  %v2664_v47 = vpop.f32.mrb[25].mxu1  ;;  %v3817_v52 = vpop.f32.mrb[27].mxu0 }
 0x206   : > { %3905 = vst.msk [vmem:[%s6297_s15 + $0x30] sm:$0xff] %vm390_vm0, %v3889_v37  ;;  %v5194_v0 = vadd.f32 %v6285_v62, %v2664_v47  ;;  %v5212_v6 = vadd.f32 %v6272_v61, %v3817_v52 }
 0x207   : > { %v3892_v28 = vmax.f32 %v5193_v36, 0.0  ;;  %3926 = vst.msk [vmem:[%s6278_s10 + $0x58] sm:$0xff] %vm390_vm0, %v5211_v46 }
 0x208   : > { %v3891_v10 = vmax.f32 %v5194_v0, 0.0  ;;  %3925 = vst.msk [vmem:[%s6278_s10 + $0x50] sm:$0xff] %vm390_vm0, %v5212_v6  ;;  %v4810_v44 = vpop.f32.mrb[26].mxu1  ;;  %v5005_v56 = vpop.f32.mrb[28].mxu0 }
 0x209   : > { %3908 = vst.msk [vmem:[%s6297_s15 + $0x48] sm:$0xff] %vm390_vm0, %v3892_v28  ;;  %v5195_v22 = vadd.f32 %v4810_v44, %v6285_v62  ;;  %v5213_v48 = vadd.f32 %v5005_v56, %v6272_v61  ;;  %v2676_v8 = vpop.f32.mrb[27].mxu1  ;;  %v3829_v11 = vpop.f32.mrb[29].mxu0 }
 0x20a   : > { %3907 = vst.msk [vmem:[%s6297_s15 + $0x40] sm:$0xff] %vm390_vm0, %v3891_v10  ;;  %v5196_v29 = vadd.f32 %v6285_v62, %v2676_v8  ;;  %v5214_v23 = vadd.f32 %v6272_v61, %v3829_v11 }
 0x20b   : > { %v3894_v43 = vmax.f32 %v5195_v22, 0.0  ;;  %3928 = vst.msk [vmem:[%s6278_s10 + $0x68] sm:$0xff] %vm390_vm0, %v5213_v48 }
 0x20c   : > { %v3893_v16 = vmax.f32 %v5196_v29, 0.0  ;;  %3927 = vst.msk [vmem:[%s6278_s10 + $0x60] sm:$0xff] %vm390_vm0, %v5214_v23  ;;  %v4813_v9 = vpop.f32.mrb[28].mxu1  ;;  %v5008_v58 = vpop.f32.mrb[30].mxu0 }
 0x20d   : > { %3910 = vst.msk [vmem:[%s6297_s15 + $0x58] sm:$0xff] %vm390_vm0, %v3894_v43  ;;  %v5197_v49 = vadd.f32 %v4813_v9, %v6285_v62  ;;  %v5215_v34 = vadd.f32 %v5008_v58, %v6272_v61  ;;  %v2688_v38 = vpop.f32.mrb[29].mxu1  ;;  %v3841_v5 = vpop.f32.mrb[31].mxu0 }
 0x20e   : > { %3909 = vst.msk [vmem:[%s6297_s15 + $0x50] sm:$0xff] %vm390_vm0, %v3893_v16  ;;  %v5198_v50 = vadd.f32 %v6285_v62, %v2688_v38  ;;  %v5216_v39 = vadd.f32 %v6272_v61, %v3841_v5 }
 0x20f   : > { %v3896_v27 = vmax.f32 %v5197_v49, 0.0  ;;  %3930 = vst.msk [vmem:[%s6278_s10 + $0x78] sm:$0xff] %vm390_vm0, %v5215_v34 }
 0x210   : > { %v3895_v24 = vmax.f32 %v5198_v50, 0.0  ;;  %3929 = vst.msk [vmem:[%s6278_s10 + $0x70] sm:$0xff] %vm390_vm0, %v5216_v39  ;;  %v4816_v3 = vpop.f32.mrb[30].mxu1 }
 0x211   : > { %3912 = vst.msk [vmem:[%s6297_s15 + $0x68] sm:$0xff] %vm390_vm0, %v3896_v27  ;;  %v5199_v59 = vadd.f32 %v4816_v3, %v6285_v62  ;;  %v2700_v14 = vpop.f32.mrb[31].mxu1 }
 0x212   : > { %3911 = vst.msk [vmem:[%s6297_s15 + $0x60] sm:$0xff] %vm390_vm0, %v3895_v24  ;;  %v5200_v4 = vadd.f32 %v6285_v62, %v2700_v14 }
 0x213   : > { %v3898_v7 = vmax.f32 %v5199_v59, 0.0 }
 0x214   : > { %v3897_v12 = vmax.f32 %v5200_v4, 0.0 }
 0x215   : > { %3914 = vst.msk [vmem:[%s6297_s15 + $0x78] sm:$0xff] %vm390_vm0, %v3898_v7 }
 0x216   : > { %3913 = vst.msk [vmem:[%s6297_s15 + $0x70] sm:$0xff] %vm390_vm0, %v3897_v12 }
 0x217 PF: > { %s20_s30 = sadd.s32 1, %s5455_s30  }
 0x218   : > { %p17_p4 = scmp.ge.s32.totalorder %s20_s30, 4  }
 0x21a   :  { %19 = sbr.rel (!%p17_p4) target bundleno = 1 (0x1), region = 102 }

</bundles_post_ra>
